<compile_context>
chip_gen: v6e
topology: v6e:2x2x1
jax: 0.10.0
libtpu: 0.0.40
codegen_flags: <defaults>
</compile_context>

<pallas_src>
import functools
import numpy as np

import jax
import jax.numpy as jnp
from jax import lax
from jax.experimental import pallas as pl
from jax.experimental.pallas import tpu as pltpu


# ----------------------------- config / constants ----------------------------

MM_DTYPE = jnp.bfloat16       # MXU operand dtype (f32 accumulation everywhere)
ATTN_OUT_DTYPE = jnp.bfloat16  # kernel-A -> kernel-B intermediate
_LN_EPS = 1e-5                 # torch.nn.LayerNorm default
_INV_SQRT2 = float(1.0 / np.sqrt(2.0))
_VMEM_CAP = 64 << 20           # safe ceiling across v5e / v6e / v7x


def _const_spec(shape):
    """Grid-invariant operand (weights / biases): constant index_map, and
    single-buffered when the installed Pallas supports pipeline_mode."""
    zeros = (0,) * len(shape)
    imap = lambda b: zeros
    if hasattr(pl, "Buffered"):
        try:
            return pl.BlockSpec(shape, imap, pipeline_mode=pl.Buffered(1))
        except TypeError:
            pass
    return pl.BlockSpec(shape, imap)


def _pick_windows_per_step(nW_img, total_windows, N, C):
    """Largest divisor of nW_img whose per-step working set fits a conservative
    activation budget while keeping enough grid steps for pipelining/megacore."""
    target_steps = min(8, total_windows)
    act_budget = 8 << 20
    best = 1
    for g in range(1, nW_img + 1):
        if nW_img % g:
            continue
        rows = g * N
        working = (rows * C * 4          # x (f32)
                   + rows * 3 * C * 2    # qkv slab (bf16)
                   + 3 * g * N * N * 4   # score temporaries (f32)
                   + rows * C * 4        # projection accumulator (f32)
                   + rows * C * 2)       # output block (bf16)
        if working <= act_budget and total_windows // g >= target_steps:
            best = g
    return best


def _row_tile(rows, C, Hd):
    """Row tile for the MLP kernel: large (HBM-bound kernel) but bounded so the
    per-step working set stays small enough for v7x's 64 MiB VMEM."""
    budget = 8 << 20
    per_row = 4 * C * 3 + 4 * Hd + 2 * C
    cap = max(8, min(512, (budget // max(per_row, 1)) // 8 * 8))
    for t in (512, 256, 128, 64, 32, 16, 8):
        if t <= cap and rows % t == 0 and rows // t >= 2:
            return t
    return rows


# ------------------------- kernel A: attention stage -------------------------

def _attn_body(xw_ref, ln_g_ref, ln_b_ref, qkv_w_ref, qkv_b_ref,
               proj_w_ref, proj_b_ref, bias_ref, mask_ref, o_ref,
               *, num_heads, fuse_ln):
    G, N, C = xw_ref.shape
    hd = C // num_heads
    rows = G * N

    x = xw_ref[...].astype(jnp.float32).reshape(rows, C)

    if fuse_ln:                                   # LayerNorm fused in-kernel (f32 stats)
        mean = jnp.mean(x, axis=-1, keepdims=True)
        var = jnp.mean((x - mean) ** 2, axis=-1, keepdims=True)
        x = (x - mean) * lax.rsqrt(var + _LN_EPS)
        x = x * ln_g_ref[...].astype(jnp.float32) + ln_b_ref[...].astype(jnp.float32)

    # fused QKV projection; scale already folded into qkv_w[:, :C] / qkv_b[:C].
    qkv = jnp.dot(x.astype(MM_DTYPE), qkv_w_ref[...],
                  preferred_element_type=jnp.float32)
    qkv = (qkv + qkv_b_ref[...].astype(jnp.float32)).astype(MM_DTYPE)   # bf16 slab

    if mask_ref is not None:
        mask = mask_ref[...].astype(jnp.float32)                        # (G, N, N)

    # Full-lane-width f32 accumulator; per-head output projection fused in.
    acc = jnp.zeros((rows, C), jnp.float32)

    # TODO(synk): for high-head-count stages (>8 heads) switch this static unroll
    # to lax.fori_loop(unroll=2) with dynamic head slices to bound live ranges.
    # TODO(synk): softmax lane occupancy is N/128; packing G*N_k into the lane
    # axis would cut VPU/EUP work further at real Swin sizes.
    for h in range(num_heads):
        q = qkv[:, h * hd:(h + 1) * hd].reshape(G, N, hd)
        k = qkv[:, C + h * hd: C + (h + 1) * hd].reshape(G, N, hd)
        v = qkv[:, 2 * C + h * hd: 2 * C + (h + 1) * hd].reshape(G, N, hd)

        s = jnp.einsum('gqd,gkd->gqk', q, k, preferred_element_type=jnp.float32)
        s = s + bias_ref[h].astype(jnp.float32)[None, :, :]             # rel-pos bias
        if mask_ref is not None:
            s = s + mask                                                # shift mask

        s = s - jnp.max(s, axis=-1, keepdims=True)
        p = jnp.exp(s)
        denom = jnp.sum(p, axis=-1, keepdims=True)
        p = p * pl.reciprocal(denom, approx=True)                       # EUP reciprocal

        out_h = jnp.einsum('gqk,gkd->gqd', p.astype(MM_DTYPE), v,
                           preferred_element_type=jnp.float32)
        # per-head fused output projection: (rows, hd) @ (hd, C)
        acc = acc + jnp.dot(out_h.reshape(rows, hd).astype(MM_DTYPE),
                            proj_w_ref[h * hd:(h + 1) * hd, :],
                            preferred_element_type=jnp.float32)

    y = acc + proj_b_ref[...].astype(jnp.float32)
    o_ref[...] = y.reshape(G, N, C).astype(o_ref.dtype)


def _attn_kernel_masked(xw_ref, ln_g_ref, ln_b_ref, qkv_w_ref, qkv_b_ref,
                        proj_w_ref, proj_b_ref, bias_ref, mask_ref, o_ref,
                        *, num_heads, fuse_ln):
    _attn_body(xw_ref, ln_g_ref, ln_b_ref, qkv_w_ref, qkv_b_ref,
               proj_w_ref, proj_b_ref, bias_ref, mask_ref, o_ref,
               num_heads=num_heads, fuse_ln=fuse_ln)


def _attn_kernel_nomask(xw_ref, ln_g_ref, ln_b_ref, qkv_w_ref, qkv_b_ref,
                        proj_w_ref, proj_b_ref, bias_ref, o_ref,
                        *, num_heads, fuse_ln):
    _attn_body(xw_ref, ln_g_ref, ln_b_ref, qkv_w_ref, qkv_b_ref,
               proj_w_ref, proj_b_ref, bias_ref, None, o_ref,
               num_heads=num_heads, fuse_ln=fuse_ln)


def attention_stage(xw, ln_g, ln_b, qkv_w, qkv_b, proj_w, proj_b, rel_bias, mask,
                    *, num_heads, scale, fuse_ln, windows_per_image):
    B_, N, C = xw.shape
    hd = C // num_heads
    nW_img = windows_per_image
    assert B_ % nW_img == 0

    G = _pick_windows_per_step(nW_img, B_, N, C)
    chunks_per_img = nW_img // G
    grid = (B_ // G,)

    # fold the softmax scale into the q-slice of the QKV projection (trace time)
    qkv_w_s = jnp.concatenate([qkv_w[:, :C] * scale, qkv_w[:, C:]], axis=1).astype(MM_DTYPE)
    qkv_b_s = jnp.concatenate([qkv_b[:C] * scale, qkv_b[C:]]).reshape(1, 3 * C)

    in_specs = [
        pl.BlockSpec((G, N, C), lambda b: (b, 0, 0)),      # window activations
        _const_spec((1, C)),                               # ln1 gamma
        _const_spec((1, C)),                               # ln1 beta
        _const_spec((C, 3 * C)),                           # qkv weight (scaled, bf16)
        _const_spec((1, 3 * C)),                           # qkv bias (scaled)
        _const_spec((C, C)),                               # proj weight (bf16)
        _const_spec((1, C)),                               # proj bias
        _const_spec((num_heads, N, N)),                    # rel-pos bias
    ]
    args = [xw, ln_g.reshape(1, C), ln_b.reshape(1, C), qkv_w_s, qkv_b_s,
            proj_w.astype(MM_DTYPE), proj_b.reshape(1, C),
            rel_bias.astype(jnp.float32)]

    if mask is not None:
        in_specs.append(pl.BlockSpec((G, N, N),
                                     lambda b: (b % chunks_per_img, 0, 0)))
        args.append(mask.astype(jnp.float32))
        kern = functools.partial(_attn_kernel_masked, num_heads=num_heads,
                                 fuse_ln=fuse_ln)
    else:
        kern = functools.partial(_attn_kernel_nomask, num_heads=num_heads,
                                 fuse_ln=fuse_ln)

    flops = int(2 * B_ * N * C * 3 * C              # qkv
                + 4 * B_ * num_heads * N * N * hd   # qk^T + pv
                + 2 * B_ * N * C * C)               # fused per-head proj
    bytes_accessed = int(4 * B_ * N * C + 2 * B_ * N * C
                         + 2 * (C * 3 * C + C * C)
                         + 4 * num_heads * N * N
                         + (4 * nW_img * N * N if mask is not None else 0))

    vmem_bytes = (2 * G * N * C * 4 + 2 * G * N * C * 2          # in/out blocks (2-buf)
                  + 2 * (C * 3 * C + C * C)                      # bf16 weights (1-buf)
                  + 4 * num_heads * N * N
                  + (2 * 4 * G * N * N if mask is not None else 0)
                  + 2 * G * N * 3 * C + 4 * G * N * C            # qkv slab + accumulator
                  + 3 * 4 * G * N * N + 4 * 8 * C)               # score temps + vectors
    vmem_limit = int(min(_VMEM_CAP, max(2 * vmem_bytes, 16 << 20)))

    return pl.pallas_call(
        kern,
        out_shape=jax.ShapeDtypeStruct((B_, N, C), ATTN_OUT_DTYPE),
        grid=grid,
        in_specs=in_specs,
        out_specs=pl.BlockSpec((G, N, C), lambda b: (b, 0, 0)),
        compiler_params=pltpu.CompilerParams(
            dimension_semantics=("parallel",),
            vmem_limit_bytes=vmem_limit),
        cost_estimate=pl.CostEstimate(flops=flops,
                                      transcendentals=int(B_ * num_heads * N * N),
                                      bytes_accessed=bytes_accessed),
    )(*args)


# ------------------ kernel B: residual + LN2 + MLP + residual -----------------

def _mlp_stage_kernel(x_ref, xr_ref, ln_g_ref, ln_b_ref, w1_ref, b1_ref,
                      w2_ref, b2_ref, o_ref):
    x = x_ref[...].astype(jnp.float32) + xr_ref[...].astype(jnp.float32)  # residual 1

    mean = jnp.mean(x, axis=-1, keepdims=True)
    var = jnp.mean((x - mean) ** 2, axis=-1, keepdims=True)
    xn = (x - mean) * lax.rsqrt(var + _LN_EPS)
    xn = xn * ln_g_ref[...].astype(jnp.float32) + ln_b_ref[...].astype(jnp.float32)

    h = jnp.dot(xn.astype(MM_DTYPE), w1_ref[...], preferred_element_type=jnp.float32)
    h = h + b1_ref[...].astype(jnp.float32)
    h = 0.5 * h * (1.0 + lax.erf(h * _INV_SQRT2))       # exact GELU (torch.nn.GELU)

    y = jnp.dot(h.astype(MM_DTYPE), w2_ref[...], preferred_element_type=jnp.float32)
    y = y + b2_ref[...].astype(jnp.float32)
    o_ref[...] = (x + y).astype(o_ref.dtype)            # residual 2


def mlp_stage(x2d, xr2d, ln_g, ln_b, w1, b1, w2, b2):
    M, C = x2d.shape
    Hd = w1.shape[1]
    tm = _row_tile(M, C, Hd)
    grid = (M // tm,)

    flops = int(4 * M * C * Hd)
    bytes_accessed = int(4 * M * C * 2 + 2 * M * C + 2 * 2 * C * Hd + 4 * (Hd + 3 * C))
    vmem_bytes = (2 * tm * C * 4 + 2 * tm * C * 2 + 2 * tm * C * 4    # in x2, out (2-buf)
                  + 2 * (C * Hd + Hd * C)                             # bf16 weights (1-buf)
                  + 4 * tm * Hd + 4 * tm * C * 2                      # in-kernel temps
                  + 4 * (Hd + 3 * C))
    vmem_limit = int(min(_VMEM_CAP, max(2 * vmem_bytes, 16 << 20)))

    return pl.pallas_call(
        _mlp_stage_kernel,
        out_shape=jax.ShapeDtypeStruct((M, C), x2d.dtype),
        grid=grid,
        in_specs=[
            pl.BlockSpec((tm, C), lambda i: (i, 0)),     # shortcut (f32)
            pl.BlockSpec((tm, C), lambda i: (i, 0)),     # attention branch (bf16)
            _const_spec((1, C)),
            _const_spec((1, C)),
            _const_spec((C, Hd)),
            _const_spec((1, Hd)),
            _const_spec((Hd, C)),
            _const_spec((1, C)),
        ],
        out_specs=pl.BlockSpec((tm, C), lambda i: (i, 0)),
        compiler_params=pltpu.CompilerParams(
            dimension_semantics=("parallel",),
            vmem_limit_bytes=vmem_limit),
        cost_estimate=pl.CostEstimate(flops=flops, transcendentals=int(M * Hd),
                                      bytes_accessed=bytes_accessed),
    )(x2d, xr2d, ln_g.reshape(1, C), ln_b.reshape(1, C),
      w1.astype(MM_DTYPE), b1.reshape(1, Hd), w2.astype(MM_DTYPE), b2.reshape(1, C))


# ------------------------------ JAX glue ops ---------------------------------
# TODO(synk): window_reverse could be folded into kernel A's writeback via a
# per-window out_spec index_map to save one HBM pass at real feature-map sizes.

def window_partition(x, ws):
    B, H, W, C = x.shape
    x = x.reshape(B, H // ws, ws, W // ws, ws, C)
    x = jnp.transpose(x, (0, 1, 3, 2, 4, 5))
    return x.reshape(-1, ws, ws, C)


def window_reverse(windows, ws, H, W):
    nh, nw = H // ws, W // ws
    B = windows.shape[0] // (nh * nw)
    x = windows.reshape(B, nh, nw, ws, ws, -1)
    x = jnp.transpose(x, (0, 1, 3, 2, 4, 5))
    return x.reshape(B, H, W, -1)


def _layernorm_jax(x, g, b):
    mean = jnp.mean(x, axis=-1, keepdims=True)
    var = jnp.mean((x - mean) ** 2, axis=-1, keepdims=True)
    return (x - mean) * lax.rsqrt(var + _LN_EPS) * g + b


def relative_position_index(ws):
    coords = np.stack(np.meshgrid(np.arange(ws), np.arange(ws), indexing='ij'))
    coords_flatten = coords.reshape(2, -1)
    rel = coords_flatten[:, :, None] - coords_flatten[:, None, :]
    rel = rel.transpose(1, 2, 0).astype(np.int64)
    rel[..., 0] += ws - 1
    rel[..., 1] += ws - 1
    rel[..., 0] *= 2 * ws - 1
    return rel.sum(-1)                                           # (N, N)


def build_attn_mask(H, W, ws, shift):
    """Pure-numpy (trace-time constant) shift-window mask, (nW, N, N)."""
    Hp = int(np.ceil(H / ws)) * ws
    Wp = int(np.ceil(W / ws)) * ws
    img_mask = np.zeros((1, Hp, Wp, 1), dtype=np.float32)
    h_slices = (slice(0, -ws), slice(-ws, -shift), slice(-shift, None))
    w_slices = (slice(0, -ws), slice(-ws, -shift), slice(-shift, None))
    cnt = 0
    for hs in h_slices:
        for wsl in w_slices:
            img_mask[:, hs, wsl, :] = cnt
            cnt += 1
    mw = img_mask.reshape(1, Hp // ws, ws, Wp // ws, ws, 1)
    mw = mw.transpose(0, 1, 3, 2, 4, 5).reshape(-1, ws * ws)
    attn_mask = mw[:, None, :] - mw[:, :, None]
    attn_mask = np.where(attn_mask != 0, -100.0, 0.0).astype(np.float32)
    return jnp.asarray(attn_mask)


# -------------------------- Swin block / BasicLayer --------------------------

def swin_block_forward(x, H, W, p, window_size, shift_size, attn_mask, num_heads,
                       rel_index_flat):
    B, L, C = x.shape
    N = window_size * window_size
    head_dim = C // num_heads
    scale = head_dim ** -0.5

    shortcut = x
    xs = x.reshape(B, H, W, C)

    # pad only if spatial dims are smaller than the window (not hit here); in
    # that branch LN must run before padding to match the reference, so it is
    # applied in JAX and skipped inside the kernel.
    H_eff, W_eff = H, W
    pad_b = max(0, window_size - H)
    pad_r = max(0, window_size - W)
    fuse_ln = not (pad_b or pad_r)
    if not fuse_ln:
        xs = _layernorm_jax(xs, p['ln1_g'], p['ln1_b'])
        xs = jnp.pad(xs, ((0, 0), (0, pad_b), (0, pad_r), (0, 0)))
        H_eff, W_eff = H + pad_b, W + pad_r

    if shift_size > 0:
        xs = jnp.roll(xs, shift=(-shift_size, -shift_size), axis=(1, 2))

    xw = window_partition(xs, window_size).reshape(-1, N, C)       # (B_, N, C)
    B_ = xw.shape[0]
    nW_img = B_ // B                                               # windows per image

    rel_bias = jnp.take(p['rel_table'], rel_index_flat, axis=0)    # (N*N, heads)
    rel_bias = rel_bias.reshape(N, N, num_heads).transpose(2, 0, 1)

    # The reference passes the layer-level attn_mask to EVERY block (including
    # shift=0 ones); when it is None the mask path is skipped statically.
    attn = attention_stage(xw, p['ln1_g'], p['ln1_b'], p['qkv_w'], p['qkv_b'],
                           p['proj_w'], p['proj_b'], rel_bias, attn_mask,
                           num_heads=num_heads, scale=scale, fuse_ln=fuse_ln,
                           windows_per_image=nW_img)

    aw = attn.reshape(-1, window_size, window_size, C)             # bf16
    xr = window_reverse(aw, window_size, H_eff, W_eff)
    if shift_size > 0:
        xr = jnp.roll(xr, shift=(shift_size, shift_size), axis=(1, 2))
    xr = xr[:, :H, :W, :]
    xr2d = xr.reshape(B * H * W, C)                                # stays bf16

    out = mlp_stage(shortcut.reshape(-1, C), xr2d,
                    p['ln2_g'], p['ln2_b'],
                    p['mlp_w1'], p['mlp_b1'], p['mlp_w2'], p['mlp_b2'])
    return out.reshape(B, L, C)


@functools.partial(jax.jit, static_argnums=(1, 2, 4, 5))
def _basic_layer_core(x, H, W, block_params, window_size, num_heads):
    depth = len(block_params)
    layer_shift = window_size // 2
    # The reference BasicLayer builds ONE attn_mask and passes it to EVERY block
    # (including shift=0 blocks); reproduced exactly.
    attn_mask = build_attn_mask(H, W, window_size, layer_shift) if layer_shift > 0 else None
    rel_idx = jnp.asarray(relative_position_index(window_size).reshape(-1), jnp.int32)

    for i in range(depth):
        blk_shift = 0 if i % 2 == 0 else layer_shift
        x = swin_block_forward(x, H, W, block_params[i], window_size, blk_shift,
                               attn_mask, num_heads, rel_idx)
    return x


def basic_layer_forward(x, H, W, block_params, window_size, num_heads):
    out = _basic_layer_core(x, H, W, tuple(block_params), window_size, num_heads)
    # downsample=None branch of BasicLayer.forward
    return out, H, W, out, H, W


# ------------------------------ parameter init --------------------------------

def init_block_params(key, dim, num_heads, window_size, mlp_ratio=4.0):
    hidden = int(dim * mlp_ratio)
    ks = jax.random.split(key, 5)
    f32 = jnp.float32
    return {
        'ln1_g': jnp.ones((dim,), f32), 'ln1_b': jnp.zeros((dim,), f32),
        'qkv_w': 0.02 * jax.random.normal(ks[0], (dim, 3 * dim), f32),
        'qkv_b': jnp.zeros((3 * dim,), f32),
        'proj_w': 0.02 * jax.random.normal(ks[1], (dim, dim), f32),
        'proj_b': jnp.zeros((dim,), f32),
        'rel_table': 0.02 * jax.random.normal(
            ks[2], ((2 * window_size - 1) ** 2, num_heads), f32),
        'ln2_g': jnp.ones((dim,), f32), 'ln2_b': jnp.zeros((dim,), f32),
        'mlp_w1': 0.02 * jax.random.normal(ks[3], (dim, hidden), f32),
        'mlp_b1': jnp.zeros((hidden,), f32),
        'mlp_w2': 0.02 * jax.random.normal(ks[4], (hidden, dim), f32),
        'mlp_b2': jnp.zeros((dim,), f32),
    }


# ----------------------------------- main -------------------------------------

if __name__ == "__main__":
    B, H, W, C = 2, 8, 8, 32
    window_size, num_heads, depth = 4, 2, 2

    key = jax.random.PRNGKey(0)
    kx, kp = jax.random.split(key)
    x = jax.random.normal(kx, (B, H * W, C), jnp.float32)

    pkeys = jax.random.split(kp, depth)
    block_params = [init_block_params(pkeys[i], C, num_heads, window_size)
                    for i in range(depth)]

    out, Ho, Wo, out_next, Hn, Wn = basic_layer_forward(x, H, W, block_params,
                                                        window_size, num_heads)
    jax.block_until_ready(out)
    assert out.shape == (B, H * W, C) and out_next.shape == (B, H * W, C)
    assert bool(jnp.all(jnp.isfinite(out)))
    print("KERNEL_OK")
</pallas_src>

<mosaic_0001>
module attributes {stable_mosaic.version = 11 : i64} {
  func.func @_attn_kernel_masked(%arg0: i32, %arg1: memref<1x16x32xf32, #tpu.memory_space<vmem>>, %arg2: memref<1x32xf32, #tpu.memory_space<vmem>>, %arg3: memref<1x32xf32, #tpu.memory_space<vmem>>, %arg4: memref<32x96xbf16, #tpu.memory_space<vmem>>, %arg5: memref<1x96xf32, #tpu.memory_space<vmem>>, %arg6: memref<32x32xbf16, #tpu.memory_space<vmem>>, %arg7: memref<1x32xf32, #tpu.memory_space<vmem>>, %arg8: memref<2x16x16xf32, #tpu.memory_space<vmem>>, %arg9: memref<1x16x16xf32, #tpu.memory_space<vmem>>, %arg10: memref<1x16x32xbf16, #tpu.memory_space<vmem>>) attributes {dimension_semantics = [#tpu.dimension_semantics<parallel>], iteration_bounds = array<i64: 8>, scalar_prefetch = 0 : i64, scratch_operands = 0 : i64, tpu.core_type = #tpu.core_type<tc>, window_params = [{transform_indices = @transform_0, window_bounds = array<i64: 1, 16, 32>}, {pipeline_mode = #tpu.pipeline_mode<synchronous>, transform_indices = @transform_1, window_bounds = array<i64: 1, 32>}, {pipeline_mode = #tpu.pipeline_mode<synchronous>, transform_indices = @transform_2, window_bounds = array<i64: 1, 32>}, {pipeline_mode = #tpu.pipeline_mode<synchronous>, transform_indices = @transform_3, window_bounds = array<i64: 32, 96>}, {pipeline_mode = #tpu.pipeline_mode<synchronous>, transform_indices = @transform_4, window_bounds = array<i64: 1, 96>}, {pipeline_mode = #tpu.pipeline_mode<synchronous>, transform_indices = @transform_5, window_bounds = array<i64: 32, 32>}, {pipeline_mode = #tpu.pipeline_mode<synchronous>, transform_indices = @transform_6, window_bounds = array<i64: 1, 32>}, {pipeline_mode = #tpu.pipeline_mode<synchronous>, transform_indices = @transform_7, window_bounds = array<i64: 2, 16, 16>}, {transform_indices = @transform_8, window_bounds = array<i64: 1, 16, 16>}, {transform_indices = @transform_9, window_bounds = array<i64: 1, 16, 32>}]} {
    %c0 = arith.constant 0 : index
    %c0_0 = arith.constant 0 : index
    %c0_1 = arith.constant 0 : index
    %0 = vector.load %arg1[%c0, %c0_0, %c0_1] : memref<1x16x32xf32, #tpu.memory_space<vmem>>, vector<1x16x32xf32>
    %1 = vector.shape_cast %0 : vector<1x16x32xf32> to vector<16x32xf32>
    %cst = arith.constant dense<0.000000e+00> : vector<16xf32>
    %2 = vector.multi_reduction <add>, %1, %cst [1] : vector<16x32xf32> to vector<16xf32>
    %3 = vector.shape_cast %2 : vector<16xf32> to vector<16x1xf32>
    %cst_2 = arith.constant 3.200000e+01 : f32
    %4 = vector.broadcast %cst_2 : f32 to vector<16x1xf32>
    %5 = arith.divf %3, %4 : vector<16x1xf32>
    %6 = vector.broadcast %5 : vector<16x1xf32> to vector<16x32xf32>
    %7 = arith.subf %1, %6 : vector<16x32xf32>
    %8 = arith.mulf %7, %7 : vector<16x32xf32>
    %cst_3 = arith.constant dense<0.000000e+00> : vector<16xf32>
    %9 = vector.multi_reduction <add>, %8, %cst_3 [1] : vector<16x32xf32> to vector<16xf32>
    %10 = vector.shape_cast %9 : vector<16xf32> to vector<16x1xf32>
    %cst_4 = arith.constant 3.200000e+01 : f32
    %11 = vector.broadcast %cst_4 : f32 to vector<16x1xf32>
    %12 = arith.divf %10, %11 : vector<16x1xf32>
    %13 = vector.broadcast %5 : vector<16x1xf32> to vector<16x32xf32>
    %14 = arith.subf %1, %13 : vector<16x32xf32>
    %cst_5 = arith.constant 9.99999974E-6 : f32
    %15 = vector.broadcast %cst_5 : f32 to vector<16x1xf32>
    %16 = arith.addf %12, %15 : vector<16x1xf32>
    %17 = math.rsqrt %16 : vector<16x1xf32>
    %18 = vector.broadcast %17 : vector<16x1xf32> to vector<16x32xf32>
    %19 = arith.mulf %14, %18 : vector<16x32xf32>
    %c0_6 = arith.constant 0 : index
    %c0_7 = arith.constant 0 : index
    %20 = vector.load %arg2[%c0_6, %c0_7] : memref<1x32xf32, #tpu.memory_space<vmem>>, vector<1x32xf32>
    %21 = vector.broadcast %20 : vector<1x32xf32> to vector<16x32xf32>
    %22 = arith.mulf %19, %21 : vector<16x32xf32>
    %c0_8 = arith.constant 0 : index
    %c0_9 = arith.constant 0 : index
    %23 = vector.load %arg3[%c0_8, %c0_9] : memref<1x32xf32, #tpu.memory_space<vmem>>, vector<1x32xf32>
    %24 = vector.broadcast %23 : vector<1x32xf32> to vector<16x32xf32>
    %25 = arith.addf %22, %24 : vector<16x32xf32>
    %26 = arith.truncf %25 : vector<16x32xf32> to vector<16x32xbf16>
    %c0_10 = arith.constant 0 : index
    %c0_11 = arith.constant 0 : index
    %27 = vector.load %arg4[%c0_10, %c0_11] : memref<32x96xbf16, #tpu.memory_space<vmem>>, vector<32x96xbf16>
    %cst_12 = arith.constant dense<0.000000e+00> : vector<16x96xf32>
    %28 = tpu.matmul %26, %27, %cst_12 {dimension_numbers = #tpu.dot_dimension_numbers<[1], [0], [0], [1], [0, 0, 1, 1], [], []>} : vector<16x32xbf16>, vector<32x96xbf16>, vector<16x96xf32> -> vector<16x96xf32>
    %c0_13 = arith.constant 0 : index
    %c0_14 = arith.constant 0 : index
    %29 = vector.load %arg5[%c0_13, %c0_14] : memref<1x96xf32, #tpu.memory_space<vmem>>, vector<1x96xf32>
    %30 = vector.broadcast %29 : vector<1x96xf32> to vector<16x96xf32>
    %31 = arith.addf %28, %30 : vector<16x96xf32>
    %32 = arith.truncf %31 : vector<16x96xf32> to vector<16x96xbf16>
    %c0_15 = arith.constant 0 : index
    %c0_16 = arith.constant 0 : index
    %c0_17 = arith.constant 0 : index
    %33 = vector.load %arg9[%c0_15, %c0_16, %c0_17] : memref<1x16x16xf32, #tpu.memory_space<vmem>>, vector<1x16x16xf32>
    %cst_18 = arith.constant 0.000000e+00 : f32
    %34 = vector.broadcast %cst_18 : f32 to vector<16x32xf32>
    %35 = vector.extract_strided_slice %32 {offsets = [0, 0], sizes = [16, 16], strides = [1, 1]} : vector<16x96xbf16> to vector<16x16xbf16>
    %36 = vector.shape_cast %35 : vector<16x16xbf16> to vector<1x16x16xbf16>
    %37 = vector.extract_strided_slice %32 {offsets = [0, 32], sizes = [16, 16], strides = [1, 1]} : vector<16x96xbf16> to vector<16x16xbf16>
    %38 = vector.shape_cast %37 : vector<16x16xbf16> to vector<1x16x16xbf16>
    %39 = vector.extract_strided_slice %32 {offsets = [0, 64], sizes = [16, 16], strides = [1, 1]} : vector<16x96xbf16> to vector<16x16xbf16>
    %40 = vector.shape_cast %39 : vector<16x16xbf16> to vector<1x16x16xbf16>
    "tpu.trace_start"() <{level = 10 : i32, message = "gqd,gkd->gqk"}> : () -> ()
    %cst_19 = arith.constant dense<0.000000e+00> : vector<1x16x16xf32>
    %41 = tpu.matmul %36, %38, %cst_19 {dimension_numbers = #tpu.dot_dimension_numbers<[2], [2], [1], [1], [0, 0, 0, 1, 1, 1], [0], [0]>} : vector<1x16x16xbf16>, vector<1x16x16xbf16>, vector<1x16x16xf32> -> vector<1x16x16xf32>
    "tpu.trace_stop"() : () -> ()
    %c0_20 = arith.constant 0 : index
    %c0_21 = arith.constant 0 : index
    %c0_22 = arith.constant 0 : index
    %42 = vector.load %arg8[%c0_20, %c0_21, %c0_22] : memref<2x16x16xf32, #tpu.memory_space<vmem>>, vector<1x16x16xf32>
    %43 = vector.shape_cast %42 : vector<1x16x16xf32> to vector<16x16xf32>
    %44 = vector.shape_cast %43 : vector<16x16xf32> to vector<1x16x16xf32>
    %45 = arith.addf %41, %44 : vector<1x16x16xf32>
    %46 = arith.addf %45, %33 : vector<1x16x16xf32>
    %cst_23 = arith.constant dense<0xFF800000> : vector<1x16xf32>
    %47 = vector.multi_reduction <maximumf>, %46, %cst_23 [2] : vector<1x16x16xf32> to vector<1x16xf32>
    %48 = vector.shape_cast %47 : vector<1x16xf32> to vector<1x16x1xf32>
    %49 = vector.broadcast %48 : vector<1x16x1xf32> to vector<1x16x16xf32>
    %50 = arith.subf %46, %49 : vector<1x16x16xf32>
    %51 = math.exp %50 : vector<1x16x16xf32>
    %cst_24 = arith.constant dense<0.000000e+00> : vector<1x16xf32>
    %52 = vector.multi_reduction <add>, %51, %cst_24 [2] : vector<1x16x16xf32> to vector<1x16xf32>
    %53 = vector.shape_cast %52 : vector<1x16xf32> to vector<1x16x1xf32>
    %54 = tpu.reciprocal %53 {approx = true} : vector<1x16x1xf32> -> vector<1x16x1xf32>
    %55 = vector.broadcast %54 : vector<1x16x1xf32> to vector<1x16x16xf32>
    %56 = arith.mulf %51, %55 : vector<1x16x16xf32>
    %57 = arith.truncf %56 : vector<1x16x16xf32> to vector<1x16x16xbf16>
    "tpu.trace_start"() <{level = 10 : i32, message = "gqk,gkd->gqd"}> : () -> ()
    %cst_25 = arith.constant dense<0.000000e+00> : vector<1x16x16xf32>
    %58 = tpu.matmul %57, %40, %cst_25 {dimension_numbers = #tpu.dot_dimension_numbers<[2], [1], [1], [2], [0, 0, 0, 1, 1, 2], [0], [0]>} : vector<1x16x16xbf16>, vector<1x16x16xbf16>, vector<1x16x16xf32> -> vector<1x16x16xf32>
    "tpu.trace_stop"() : () -> ()
    %59 = vector.shape_cast %58 : vector<1x16x16xf32> to vector<16x16xf32>
    %60 = arith.truncf %59 : vector<16x16xf32> to vector<16x16xbf16>
    %c0_26 = arith.constant 0 : index
    %c0_27 = arith.constant 0 : index
    %61 = vector.load %arg6[%c0_26, %c0_27] : memref<32x32xbf16, #tpu.memory_space<vmem>>, vector<16x32xbf16>
    %cst_28 = arith.constant dense<0.000000e+00> : vector<16x32xf32>
    %62 = tpu.matmul %60, %61, %cst_28 {dimension_numbers = #tpu.dot_dimension_numbers<[1], [0], [0], [1], [0, 0, 1, 1], [], []>} : vector<16x16xbf16>, vector<16x32xbf16>, vector<16x32xf32> -> vector<16x32xf32>
    %63 = arith.addf %34, %62 : vector<16x32xf32>
    %64 = vector.extract_strided_slice %32 {offsets = [0, 16], sizes = [16, 16], strides = [1, 1]} : vector<16x96xbf16> to vector<16x16xbf16>
    %65 = vector.shape_cast %64 : vector<16x16xbf16> to vector<1x16x16xbf16>
    %66 = vector.extract_strided_slice %32 {offsets = [0, 48], sizes = [16, 16], strides = [1, 1]} : vector<16x96xbf16> to vector<16x16xbf16>
    %67 = vector.shape_cast %66 : vector<16x16xbf16> to vector<1x16x16xbf16>
    %68 = vector.extract_strided_slice %32 {offsets = [0, 80], sizes = [16, 16], strides = [1, 1]} : vector<16x96xbf16> to vector<16x16xbf16>
    %69 = vector.shape_cast %68 : vector<16x16xbf16> to vector<1x16x16xbf16>
    "tpu.trace_start"() <{level = 10 : i32, message = "gqd,gkd->gqk"}> : () -> ()
    %cst_29 = arith.constant dense<0.000000e+00> : vector<1x16x16xf32>
    %70 = tpu.matmul %65, %67, %cst_29 {dimension_numbers = #tpu.dot_dimension_numbers<[2], [2], [1], [1], [0, 0, 0, 1, 1, 1], [0], [0]>} : vector<1x16x16xbf16>, vector<1x16x16xbf16>, vector<1x16x16xf32> -> vector<1x16x16xf32>
    "tpu.trace_stop"() : () -> ()
    %c1 = arith.constant 1 : index
    %c0_30 = arith.constant 0 : index
    %c0_31 = arith.constant 0 : index
    %71 = vector.load %arg8[%c1, %c0_30, %c0_31] : memref<2x16x16xf32, #tpu.memory_space<vmem>>, vector<1x16x16xf32>
    %72 = vector.shape_cast %71 : vector<1x16x16xf32> to vector<16x16xf32>
    %73 = vector.shape_cast %72 : vector<16x16xf32> to vector<1x16x16xf32>
    %74 = arith.addf %70, %73 : vector<1x16x16xf32>
    %75 = arith.addf %74, %33 : vector<1x16x16xf32>
    %cst_32 = arith.constant dense<0xFF800000> : vector<1x16xf32>
    %76 = vector.multi_reduction <maximumf>, %75, %cst_32 [2] : vector<1x16x16xf32> to vector<1x16xf32>
    %77 = vector.shape_cast %76 : vector<1x16xf32> to vector<1x16x1xf32>
    %78 = vector.broadcast %77 : vector<1x16x1xf32> to vector<1x16x16xf32>
    %79 = arith.subf %75, %78 : vector<1x16x16xf32>
    %80 = math.exp %79 : vector<1x16x16xf32>
    %cst_33 = arith.constant dense<0.000000e+00> : vector<1x16xf32>
    %81 = vector.multi_reduction <add>, %80, %cst_33 [2] : vector<1x16x16xf32> to vector<1x16xf32>
    %82 = vector.shape_cast %81 : vector<1x16xf32> to vector<1x16x1xf32>
    %83 = tpu.reciprocal %82 {approx = true} : vector<1x16x1xf32> -> vector<1x16x1xf32>
    %84 = vector.broadcast %83 : vector<1x16x1xf32> to vector<1x16x16xf32>
    %85 = arith.mulf %80, %84 : vector<1x16x16xf32>
    %86 = arith.truncf %85 : vector<1x16x16xf32> to vector<1x16x16xbf16>
    "tpu.trace_start"() <{level = 10 : i32, message = "gqk,gkd->gqd"}> : () -> ()
    %cst_34 = arith.constant dense<0.000000e+00> : vector<1x16x16xf32>
    %87 = tpu.matmul %86, %69, %cst_34 {dimension_numbers = #tpu.dot_dimension_numbers<[2], [1], [1], [2], [0, 0, 0, 1, 1, 2], [0], [0]>} : vector<1x16x16xbf16>, vector<1x16x16xbf16>, vector<1x16x16xf32> -> vector<1x16x16xf32>
    "tpu.trace_stop"() : () -> ()
    %88 = vector.shape_cast %87 : vector<1x16x16xf32> to vector<16x16xf32>
    %89 = arith.truncf %88 : vector<16x16xf32> to vector<16x16xbf16>
    %c16 = arith.constant 16 : index
    %c0_35 = arith.constant 0 : index
    %90 = vector.load %arg6[%c16, %c0_35] : memref<32x32xbf16, #tpu.memory_space<vmem>>, vector<16x32xbf16>
    %cst_36 = arith.constant dense<0.000000e+00> : vector<16x32xf32>
    %91 = tpu.matmul %89, %90, %cst_36 {dimension_numbers = #tpu.dot_dimension_numbers<[1], [0], [0], [1], [0, 0, 1, 1], [], []>} : vector<16x16xbf16>, vector<16x32xbf16>, vector<16x32xf32> -> vector<16x32xf32>
    %92 = arith.addf %63, %91 : vector<16x32xf32>
    %c0_37 = arith.constant 0 : index
    %c0_38 = arith.constant 0 : index
    %93 = vector.load %arg7[%c0_37, %c0_38] : memref<1x32xf32, #tpu.memory_space<vmem>>, vector<1x32xf32>
    %94 = vector.broadcast %93 : vector<1x32xf32> to vector<16x32xf32>
    %95 = arith.addf %92, %94 : vector<16x32xf32>
    %96 = vector.shape_cast %95 : vector<16x32xf32> to vector<1x16x32xf32>
    %97 = arith.truncf %96 : vector<1x16x32xf32> to vector<1x16x32xbf16>
    %c0_39 = arith.constant 0 : index
    %c0_40 = arith.constant 0 : index
    %c0_41 = arith.constant 0 : index
    %98 = vector.load %arg10[%c0_39, %c0_40, %c0_41] : memref<1x16x32xbf16, #tpu.memory_space<vmem>>, vector<1x16x32xbf16>
    tpu.vector_store %arg10[%c0_39, %c0_40, %c0_41], %97 {strides = array<i32>} : memref<1x16x32xbf16, #tpu.memory_space<vmem>>, vector<1x16x32xbf16>,
    return
  }
  func.func @transform_0(%arg0: i32) -> (i32, i32, i32) {
    %c0_i32 = arith.constant 0 : i32
    %c0_i32_0 = arith.constant 0 : i32
    %c0_i32_1 = arith.constant 0 : i32
    return %arg0, %c0_i32, %c0_i32_0 : i32, i32, i32
  }
  func.func @transform_1(%arg0: i32) -> (i32, i32) {
    %c0_i32 = arith.constant 0 : i32
    %c0_i32_0 = arith.constant 0 : i32
    %c0_i32_1 = arith.constant 0 : i32
    return %c0_i32, %c0_i32_0 : i32, i32
  }
  func.func @transform_2(%arg0: i32) -> (i32, i32) {
    %c0_i32 = arith.constant 0 : i32
    %c0_i32_0 = arith.constant 0 : i32
    %c0_i32_1 = arith.constant 0 : i32
    return %c0_i32, %c0_i32_0 : i32, i32
  }
  func.func @transform_3(%arg0: i32) -> (i32, i32) {
    %c0_i32 = arith.constant 0 : i32
    %c0_i32_0 = arith.constant 0 : i32
    %c0_i32_1 = arith.constant 0 : i32
    return %c0_i32, %c0_i32_0 : i32, i32
  }
  func.func @transform_4(%arg0: i32) -> (i32, i32) {
    %c0_i32 = arith.constant 0 : i32
    %c0_i32_0 = arith.constant 0 : i32
    %c0_i32_1 = arith.constant 0 : i32
    return %c0_i32, %c0_i32_0 : i32, i32
  }
  func.func @transform_5(%arg0: i32) -> (i32, i32) {
    %c0_i32 = arith.constant 0 : i32
    %c0_i32_0 = arith.constant 0 : i32
    %c0_i32_1 = arith.constant 0 : i32
    return %c0_i32, %c0_i32_0 : i32, i32
  }
  func.func @transform_6(%arg0: i32) -> (i32, i32) {
    %c0_i32 = arith.constant 0 : i32
    %c0_i32_0 = arith.constant 0 : i32
    %c0_i32_1 = arith.constant 0 : i32
    return %c0_i32, %c0_i32_0 : i32, i32
  }
  func.func @transform_7(%arg0: i32) -> (i32, i32, i32) {
    %c0_i32 = arith.constant 0 : i32
    %c0_i32_0 = arith.constant 0 : i32
    %c0_i32_1 = arith.constant 0 : i32
    %c0_i32_2 = arith.constant 0 : i32
    return %c0_i32, %c0_i32_0, %c0_i32_1 : i32, i32, i32
  }
  func.func @transform_8(%arg0: i32) -> (i32, i32, i32) {
    %c4_i32 = arith.constant 4 : i32
    %c0_i32 = arith.constant 0 : i32
    %0 = arith.cmpi eq, %c4_i32, %c0_i32 : i32
    %c1_i32 = arith.constant 1 : i32
    %1 = arith.select %0, %c1_i32, %c4_i32 : i32
    %2 = arith.remsi %arg0, %1 : i32
    %c0_i32_0 = arith.constant 0 : i32
    %3 = arith.cmpi ne, %2, %c0_i32_0 : i32
    %c0_i32_1 = arith.constant 0 : i32
    %4 = arith.cmpi slt, %2, %c0_i32_1 : i32
    %c0_i32_2 = arith.constant 0 : i32
    %5 = arith.cmpi slt, %1, %c0_i32_2 : i32
    %6 = arith.xori %4, %5 : i1
    %7 = arith.andi %6, %3 : i1
    %8 = arith.addi %2, %1 : i32
    %9 = arith.select %7, %8, %2 : i32
    %c0_i32_3 = arith.constant 0 : i32
    %c0_i32_4 = arith.constant 0 : i32
    %c0_i32_5 = arith.constant 0 : i32
    return %9, %c0_i32_3, %c0_i32_4 : i32, i32, i32
  }
  func.func @transform_9(%arg0: i32) -> (i32, i32, i32) {
    %c0_i32 = arith.constant 0 : i32
    %c0_i32_0 = arith.constant 0 : i32
    %c0_i32_1 = arith.constant 0 : i32
    return %arg0, %c0_i32, %c0_i32_0 : i32, i32, i32
  }
}

module attributes {stable_mosaic.version = 11 : i64} {
  func.func @_mlp_stage_kernel(%arg0: i32, %arg1: memref<64x32xf32, #tpu.memory_space<vmem>>, %arg2: memref<64x32xbf16, #tpu.memory_space<vmem>>, %arg3: memref<1x32xf32, #tpu.memory_space<vmem>>, %arg4: memref<1x32xf32, #tpu.memory_space<vmem>>, %arg5: memref<32x128xbf16, #tpu.memory_space<vmem>>, %arg6: memref<1x128xf32, #tpu.memory_space<vmem>>, %arg7: memref<128x32xbf16, #tpu.memory_space<vmem>>, %arg8: memref<1x32xf32, #tpu.memory_space<vmem>>, %arg9: memref<64x32xf32, #tpu.memory_space<vmem>>) attributes {dimension_semantics = [#tpu.dimension_semantics<parallel>], iteration_bounds = array<i64: 2>, scalar_prefetch = 0 : i64, scratch_operands = 0 : i64, tpu.core_type = #tpu.core_type<tc>, window_params = [{transform_indices = @transform_0, window_bounds = array<i64: 64, 32>}, {transform_indices = @transform_1, window_bounds = array<i64: 64, 32>}, {pipeline_mode = #tpu.pipeline_mode<synchronous>, transform_indices = @transform_2, window_bounds = array<i64: 1, 32>}, {pipeline_mode = #tpu.pipeline_mode<synchronous>, transform_indices = @transform_3, window_bounds = array<i64: 1, 32>}, {pipeline_mode = #tpu.pipeline_mode<synchronous>, transform_indices = @transform_4, window_bounds = array<i64: 32, 128>}, {pipeline_mode = #tpu.pipeline_mode<synchronous>, transform_indices = @transform_5, window_bounds = array<i64: 1, 128>}, {pipeline_mode = #tpu.pipeline_mode<synchronous>, transform_indices = @transform_6, window_bounds = array<i64: 128, 32>}, {pipeline_mode = #tpu.pipeline_mode<synchronous>, transform_indices = @transform_7, window_bounds = array<i64: 1, 32>}, {transform_indices = @transform_8, window_bounds = array<i64: 64, 32>}]} {
    %c0 = arith.constant 0 : index
    %c0_0 = arith.constant 0 : index
    %0 = vector.load %arg1[%c0, %c0_0] : memref<64x32xf32, #tpu.memory_space<vmem>>, vector<64x32xf32>
    %c0_1 = arith.constant 0 : index
    %c0_2 = arith.constant 0 : index
    %1 = vector.load %arg2[%c0_1, %c0_2] : memref<64x32xbf16, #tpu.memory_space<vmem>>, vector<64x32xbf16>
    %2 = arith.extf %1 : vector<64x32xbf16> to vector<64x32xf32>
    %3 = arith.addf %0, %2 : vector<64x32xf32>
    %cst = arith.constant dense<0.000000e+00> : vector<64xf32>
    %4 = vector.multi_reduction <add>, %3, %cst [1] : vector<64x32xf32> to vector<64xf32>
    %5 = vector.shape_cast %4 : vector<64xf32> to vector<64x1xf32>
    %cst_3 = arith.constant 3.200000e+01 : f32
    %6 = vector.broadcast %cst_3 : f32 to vector<64x1xf32>
    %7 = arith.divf %5, %6 : vector<64x1xf32>
    %8 = vector.broadcast %7 : vector<64x1xf32> to vector<64x32xf32>
    %9 = arith.subf %3, %8 : vector<64x32xf32>
    %10 = arith.mulf %9, %9 : vector<64x32xf32>
    %cst_4 = arith.constant dense<0.000000e+00> : vector<64xf32>
    %11 = vector.multi_reduction <add>, %10, %cst_4 [1] : vector<64x32xf32> to vector<64xf32>
    %12 = vector.shape_cast %11 : vector<64xf32> to vector<64x1xf32>
    %cst_5 = arith.constant 3.200000e+01 : f32
    %13 = vector.broadcast %cst_5 : f32 to vector<64x1xf32>
    %14 = arith.divf %12, %13 : vector<64x1xf32>
    %15 = vector.broadcast %7 : vector<64x1xf32> to vector<64x32xf32>
    %16 = arith.subf %3, %15 : vector<64x32xf32>
    %cst_6 = arith.constant 9.99999974E-6 : f32
    %17 = vector.broadcast %cst_6 : f32 to vector<64x1xf32>
    %18 = arith.addf %14, %17 : vector<64x1xf32>
    %19 = math.rsqrt %18 : vector<64x1xf32>
    %20 = vector.broadcast %19 : vector<64x1xf32> to vector<64x32xf32>
    %21 = arith.mulf %16, %20 : vector<64x32xf32>
    %c0_7 = arith.constant 0 : index
    %c0_8 = arith.constant 0 : index
    %22 = vector.load %arg3[%c0_7, %c0_8] : memref<1x32xf32, #tpu.memory_space<vmem>>, vector<1x32xf32>
    %23 = vector.broadcast %22 : vector<1x32xf32> to vector<64x32xf32>
    %24 = arith.mulf %21, %23 : vector<64x32xf32>
    %c0_9 = arith.constant 0 : index
    %c0_10 = arith.constant 0 : index
    %25 = vector.load %arg4[%c0_9, %c0_10] : memref<1x32xf32, #tpu.memory_space<vmem>>, vector<1x32xf32>
    %26 = vector.broadcast %25 : vector<1x32xf32> to vector<64x32xf32>
    %27 = arith.addf %24, %26 : vector<64x32xf32>
    %28 = arith.truncf %27 : vector<64x32xf32> to vector<64x32xbf16>
    %c0_11 = arith.constant 0 : index
    %c0_12 = arith.constant 0 : index
    %29 = vector.load %arg5[%c0_11, %c0_12] : memref<32x128xbf16, #tpu.memory_space<vmem>>, vector<32x128xbf16>
    %cst_13 = arith.constant dense<0.000000e+00> : vector<64x128xf32>
    %30 = tpu.matmul %28, %29, %cst_13 {dimension_numbers = #tpu.dot_dimension_numbers<[1], [0], [0], [1], [0, 0, 1, 1], [], []>} : vector<64x32xbf16>, vector<32x128xbf16>, vector<64x128xf32> -> vector<64x128xf32>
    %c0_14 = arith.constant 0 : index
    %c0_15 = arith.constant 0 : index
    %31 = vector.load %arg6[%c0_14, %c0_15] : memref<1x128xf32, #tpu.memory_space<vmem>>, vector<1x128xf32>
    %32 = vector.broadcast %31 : vector<1x128xf32> to vector<64x128xf32>
    %33 = arith.addf %30, %32 : vector<64x128xf32>
    %cst_16 = arith.constant 5.000000e-01 : f32
    %34 = vector.broadcast %cst_16 : f32 to vector<64x128xf32>
    %35 = arith.mulf %34, %33 : vector<64x128xf32>
    %cst_17 = arith.constant 0.707106769 : f32
    %36 = vector.broadcast %cst_17 : f32 to vector<64x128xf32>
    %37 = arith.mulf %33, %36 : vector<64x128xf32>
    %38 = math.erf %37 : vector<64x128xf32>
    %cst_18 = arith.constant 1.000000e+00 : f32
    %39 = vector.broadcast %cst_18 : f32 to vector<64x128xf32>
    %40 = arith.addf %39, %38 : vector<64x128xf32>
    %41 = arith.mulf %35, %40 : vector<64x128xf32>
    %42 = arith.truncf %41 : vector<64x128xf32> to vector<64x128xbf16>
    %c0_19 = arith.constant 0 : index
    %c0_20 = arith.constant 0 : index
    %43 = vector.load %arg7[%c0_19, %c0_20] : memref<128x32xbf16, #tpu.memory_space<vmem>>, vector<128x32xbf16>
    %cst_21 = arith.constant dense<0.000000e+00> : vector<64x32xf32>
    %44 = tpu.matmul %42, %43, %cst_21 {dimension_numbers = #tpu.dot_dimension_numbers<[1], [0], [0], [1], [0, 0, 1, 1], [], []>} : vector<64x128xbf16>, vector<128x32xbf16>, vector<64x32xf32> -> vector<64x32xf32>
    %c0_22 = arith.constant 0 : index
    %c0_23 = arith.constant 0 : index
    %45 = vector.load %arg8[%c0_22, %c0_23] : memref<1x32xf32, #tpu.memory_space<vmem>>, vector<1x32xf32>
    %46 = vector.broadcast %45 : vector<1x32xf32> to vector<64x32xf32>
    %47 = arith.addf %44, %46 : vector<64x32xf32>
    %48 = arith.addf %3, %47 : vector<64x32xf32>
    %c0_24 = arith.constant 0 : index
    %c0_25 = arith.constant 0 : index
    %49 = vector.load %arg9[%c0_24, %c0_25] : memref<64x32xf32, #tpu.memory_space<vmem>>, vector<64x32xf32>
    tpu.vector_store %arg9[%c0_24, %c0_25], %48 {strides = array<i32>} : memref<64x32xf32, #tpu.memory_space<vmem>>, vector<64x32xf32>,
    return
  }
  func.func @transform_0(%arg0: i32) -> (i32, i32) {
    %c0_i32 = arith.constant 0 : i32
    %c0_i32_0 = arith.constant 0 : i32
    return %arg0, %c0_i32 : i32, i32
  }
  func.func @transform_1(%arg0: i32) -> (i32, i32) {
    %c0_i32 = arith.constant 0 : i32
    %c0_i32_0 = arith.constant 0 : i32
    return %arg0, %c0_i32 : i32, i32
  }
  func.func @transform_2(%arg0: i32) -> (i32, i32) {
    %c0_i32 = arith.constant 0 : i32
    %c0_i32_0 = arith.constant 0 : i32
    %c0_i32_1 = arith.constant 0 : i32
    return %c0_i32, %c0_i32_0 : i32, i32
  }
  func.func @transform_3(%arg0: i32) -> (i32, i32) {
    %c0_i32 = arith.constant 0 : i32
    %c0_i32_0 = arith.constant 0 : i32
    %c0_i32_1 = arith.constant 0 : i32
    return %c0_i32, %c0_i32_0 : i32, i32
  }
  func.func @transform_4(%arg0: i32) -> (i32, i32) {
    %c0_i32 = arith.constant 0 : i32
    %c0_i32_0 = arith.constant 0 : i32
    %c0_i32_1 = arith.constant 0 : i32
    return %c0_i32, %c0_i32_0 : i32, i32
  }
  func.func @transform_5(%arg0: i32) -> (i32, i32) {
    %c0_i32 = arith.constant 0 : i32
    %c0_i32_0 = arith.constant 0 : i32
    %c0_i32_1 = arith.constant 0 : i32
    return %c0_i32, %c0_i32_0 : i32, i32
  }
  func.func @transform_6(%arg0: i32) -> (i32, i32) {
    %c0_i32 = arith.constant 0 : i32
    %c0_i32_0 = arith.constant 0 : i32
    %c0_i32_1 = arith.constant 0 : i32
    return %c0_i32, %c0_i32_0 : i32, i32
  }
  func.func @transform_7(%arg0: i32) -> (i32, i32) {
    %c0_i32 = arith.constant 0 : i32
    %c0_i32_0 = arith.constant 0 : i32
    %c0_i32_1 = arith.constant 0 : i32
    return %c0_i32, %c0_i32_0 : i32, i32
  }
  func.func @transform_8(%arg0: i32) -> (i32, i32) {
    %c0_i32 = arith.constant 0 : i32
    %c0_i32_0 = arith.constant 0 : i32
    return %arg0, %c0_i32 : i32, i32
  }
}

</mosaic_0001>

<bundles_post_ra>
// kernel: _basic_layer_core.5
= control target key start
LH: loop header
LB: loop body
LE: loop exit
PB: predicated region body
PF: predicated region fallthrough
CT: control target
= control target key end

     0   :  { %s1075_s27 = smov 0   ;;  %s1263_s0 = inlined_call_operand.vmem [shape: f32[128,32], index: 0, kind: input, shape index: {}]   ;;  %s1264_s1 = inlined_call_operand.vmem [shape: bf16[128,32], index: 1, kind: input, shape index: {}]   ;;  %s1265_s2 = inlined_call_operand.vmem [shape: f32[1,32], index: 2, kind: input, shape index: {}]   ;;  %s1266_s3 = inlined_call_operand.vmem [shape: f32[1,32], index: 3, kind: input, shape index: {}]   ;;  %s1267_s4 = inlined_call_operand.vmem [shape: bf16[32,128], index: 4, kind: input, shape index: {}]   ;;  %s1268_s5 = inlined_call_operand.vmem [shape: f32[1,128], index: 5, kind: input, shape index: {}]   ;;  %s1269_s6 = inlined_call_operand.vmem [shape: bf16[128,32], index: 6, kind: input, shape index: {}]   ;;  %s1270_s7 = inlined_call_operand.vmem [shape: f32[1,32], index: 7, kind: input, shape index: {}]   ;;  %s1271_s8 = inlined_call_operand.vmem [shape: f32[128,32], index: 8, kind: output, shape index: {}]  }
   0x1 LB: > { %s868_s28 = sadd.s32 4294967295, %s1028_s27   ;;  %p872_p0 = scmp.ge.s32.totalorder %s1028_s27, 1  ;;  %s1028_s27 = sphi %s1075_s27, %s18_s27  }
   0x2   : > { %p274_p1 = scmp.lt.s32.totalorder %s1028_s27, 3 }
   0x4   : > { %p275_p2 = pnand %p872_p0, %p274_p1 }
   0x5   : > { %s873_s29 = sshll.u32 (!%p275_p2), %s868_s28, 3 }
   0x6   : > { %278 = sbr.rel (%p275_p2) target bundleno = 774 (0x306), region = 52  ;;  %p314_p3 = scmp.lt.s32.totalorder (!%p275_p2), %s873_s29, 15 }
   0xb   : > { %s1273_s29 = smov (!%p314_p3, %s873_s29), 15  ;;  %vm364_vm0 = vcmask 261120  }
   0xc   : > { %s874_s30 = sshll.u32 %s1273_s29, 3  ;;  %s876_s9 = sshll.u32 %s1273_s29, 2 }
   0xd   : > { %s1092_s12 = scalar_lea.vmem %s1263_s0, %s874_s30  ;;  %s323_s15 = scalar_lea.vmem %s1264_s1, %s876_s9 }
   0xe   : > { %v332_v0 = vld [vmem:[%s1092_s12] sm:$0xff]  ;;  %v334_v2 = vld [vmem:[%s1092_s12 + $0x10] sm:$0xff]  ;;  %v915_v4 = vld [vmem:[%s323_s15 + $0x8] sm:$0xff]   ;;  %s329_s28 = scalar_lea.vmem %s1271_s8, %s874_s30 }
   0xf   : > { %v900_v1 = vld [vmem:[%s323_s15] sm:$0xff]   ;;  %v333_v5 = vld [vmem:[%s1092_s12 + $0x8] sm:$0xff]  ;;  %v335_v7 = vld [vmem:[%s1092_s12 + $0x18] sm:$0xff]  ;;  %v905_v8 = vunpack.c.l.bf16 %v915_v4  ;;  %v906_v9 = vunpack.c.h.bf16 %v915_v4 }
  0x10   : > { %v901_v3 = vunpack.c.l.bf16 %v900_v1  ;;  %v902_v6 = vunpack.c.h.bf16 %v900_v1  ;;  %v916_v10 = vld [vmem:[%s323_s15 + $0x10] sm:$0xff]   ;;  %v336_v13 = vld [vmem:[%s1092_s12 + $0x20] sm:$0xff]  ;;  %v917_v15 = vld [vmem:[%s323_s15 + $0x18] sm:$0xff]  }
  0x11   : > { %v909_v14 = vunpack.c.l.bf16 %v916_v10  ;;  %v1106_v16 = vadd.f32 %v905_v8, %v334_v2  ;;  %v1108_v17 = vadd.f32 %v906_v9, %v335_v7  ;;  %v910_v18 = vunpack.c.h.bf16 %v916_v10  ;;  %v337_v20 = vld [vmem:[%s1092_s12 + $0x28] sm:$0xff]  ;;  %v338_v27 = vld [vmem:[%s1092_s12 + $0x30] sm:$0xff]  ;;  %v339_v29 = vld [vmem:[%s1092_s12 + $0x38] sm:$0xff] }
  0x12   : > { %v1101_v11 = vadd.f32 %v901_v3, %v332_v0  ;;  %v1103_v12 = vadd.f32 %v902_v6, %v333_v5  ;;  %v913_v24 = vunpack.c.l.bf16 %v917_v15  ;;  %v914_v28 = vunpack.c.h.bf16 %v917_v15  ;;  %v981_v15 = vld [vmem:[%s1267_s4] sm:$0xff]  }
  0x13   : > { %v371_v21 = vsel %vm364_vm0, %v1106_v16, 0.0  ;;  %v1117_v23 = vadd.f32 %v909_v14, %v336_v13  ;;  %v374_v25 = vsel %vm364_vm0, %v1108_v17, 0.0  ;;  %v1121_v26 = vadd.f32 %v910_v18, %v337_v20  ;;  %v980_v14 = vld [vmem:[%s1267_s4 + $0x8] sm:$0xff]  }
  0x14   : > { %v365_v19 = vsel %vm364_vm0, %v1101_v11, 0.0  ;;  %372 = vadd.xlane.f32.xlu1 %v371_v21  ;;  %v368_v22 = vsel %vm364_vm0, %v1103_v12, 0.0  ;;  %v1127_v31 = vadd.f32 %v913_v24, %v338_v27  ;;  %v1131_v33 = vadd.f32 %v914_v28, %v339_v29  ;;  %936 = vmatprep.subr.bf16.mxu0 %v980_v14 }
  0x15   : > { %366 = vadd.xlane.f32.xlu0 %v365_v19  ;;  %v377_v30 = vsel %vm364_vm0, %v1117_v23, 0.0  ;;  %v380_v32 = vsel %vm364_vm0, %v1121_v26, 0.0  ;;  %937 = vmatpush3.bf16.msra.mxu0 %v980_v14 }
  0x16   : > { %v383_v34 = vsel %vm364_vm0, %v1127_v31, 0.0  ;;  %v386_v35 = vsel %vm364_vm0, %v1131_v33, 0.0  ;;  %938 = vmatprep.subr.bf16.mxu0 %v981_v15 }
  0x18   : > { %375 = vadd.xlane.f32.xlu1 %v374_v25 }
  0x19   : > { %369 = vadd.xlane.f32.xlu0 %v368_v22  ;;  %939 = vmatpush3.bf16.msra.mxu0 %v981_v15 }
  0x1c   : > { %381 = vadd.xlane.f32.xlu1 %v380_v32 }
  0x1d   : > { %378 = vadd.xlane.f32.xlu0 %v377_v30 }
  0x20   : > { %387 = vadd.xlane.f32.xlu1 %v386_v35 }
  0x21   : > { %384 = vadd.xlane.f32.xlu0 %v383_v34 }
  0x9d   : > { %v373_v38 = vpop.xlane.xlu1 %372 }
  0x9e   : > { %v367_v36 = vpop.xlane.xlu0 %366  ;;  %v392_v39 = vmul.f32 0.03125, %v373_v38 }
  0x9f   : > { %v390_v37 = vmul.f32 0.03125, %v367_v36 }
  0xa0   : > { %v1141_v41 = vsub.f32 %v1106_v16, %v392_v39 }
  0xa1   : > { %v1138_v40 = vsub.f32 %v1101_v11, %v390_v37  ;;  %v376_v44 = vpop.xlane.xlu1 %375 }
  0xa2   : > { %v370_v42 = vpop.xlane.xlu0 %369  ;;  %v393_v46 = vmul.f32 0.03125, %v376_v44  ;;  %v408_v47 = vmul.f32 %v1141_v41, %v1141_v41 }
  0xa3   : > { %v391_v43 = vmul.f32 0.03125, %v370_v42  ;;  %v406_v45 = vmul.f32 %v1138_v40, %v1138_v40 }
  0xa4   : > { %v1152_v50 = vsub.f32 %v1108_v17, %v393_v46  ;;  %v420_v54 = vsel %vm364_vm0, %v408_v47, 0.0 }
  0xa5   : > { %v1148_v48 = vsub.f32 %v1103_v12, %v391_v43  ;;  %v414_v49 = vsel %vm364_vm0, %v406_v45, 0.0  ;;  %v382_v53 = vpop.xlane.xlu1 %381 }
  0xa6   : > { %415 = vadd.xlane.f32.xlu0 %v414_v49  ;;  %v379_v51 = vpop.xlane.xlu0 %378  ;;  %v395_v56 = vmul.f32 0.03125, %v382_v53  ;;  %v409_v57 = vmul.f32 %v1152_v50, %v1152_v50 }
  0xa7   : > { %v394_v52 = vmul.f32 0.03125, %v379_v51  ;;  %v407_v55 = vmul.f32 %v1148_v48, %v1148_v48 }
  0xa8   : > { %v1164_v60 = vsub.f32 %v1121_v26, %v395_v56  ;;  %v423_v0 = vsel %vm364_vm0, %v409_v57, 0.0  ;;  %v880_v57 = vld [vmem:[%s1266_s3] ss:$0 sm:$0xff] }
  0xa9   : > { %v1160_v58 = vsub.f32 %v1117_v23, %v394_v52  ;;  %v417_v59 = vsel %vm364_vm0, %v407_v55, 0.0  ;;  %v388_v63 = vpop.xlane.xlu1 %387  ;;  %v879_v52 = vld [vmem:[%s1265_s2] ss:$0 sm:$0xff] }
  0xaa   : > { %421 = vadd.xlane.f32.xlu0 %v420_v54  ;;  %418 = vadd.xlane.f32.xlu1 %v417_v59  ;;  %v385_v61 = vpop.xlane.xlu0 %384  ;;  %v397_v2 = vmul.f32 0.03125, %v388_v63  ;;  %v411_v3 = vmul.f32 %v1164_v60, %v1164_v60 }
  0xab   : > { %v396_v62 = vmul.f32 0.03125, %v385_v61  ;;  %v410_v1 = vmul.f32 %v1160_v58, %v1160_v58 }
  0xac   : > { %v1176_v6 = vsub.f32 %v1131_v33, %v397_v2  ;;  %v429_v7 = vsel %vm364_vm0, %v411_v3, 0.0 }
  0xad   : > { %v1172_v4 = vsub.f32 %v1127_v31, %v396_v62  ;;  %v426_v5 = vsel %vm364_vm0, %v410_v1, 0.0 }
  0xae   : > { %424 = vadd.xlane.f32.xlu1 %v423_v0  ;;  %427 = vadd.xlane.f32.xlu0 %v426_v5  ;;  %v413_v9 = vmul.f32 %v1176_v6, %v1176_v6 }
  0xaf   : > { %v412_v8 = vmul.f32 %v1172_v4, %v1172_v4 }
  0xb0   : > { %v435_v13 = vsel %vm364_vm0, %v413_v9, 0.0 }
  0xb1   : > { %v432_v10 = vsel %vm364_vm0, %v412_v8, 0.0 }
  0xb2   : > { %430 = vadd.xlane.f32.xlu1 %v429_v7  ;;  %433 = vadd.xlane.f32.xlu0 %v432_v10 }
  0xb6   : > { %436 = vadd.xlane.f32.xlu1 %v435_v13 }
 0x12f   : > { %v416_v18 = vpop.xlane.xlu0 %415 }
 0x130   : > { %v438_v19 = vmul.f32 0.03125, %v416_v18 }
 0x132   : > { %v446_v20 = vadd.f32 1e-05, %v438_v19 }
 0x133   : > { %v419_v21 = vpop.xlane.xlu1 %418  ;;  %v422_v22 = vpop.xlane.xlu0 %421 }
 0x134   : > { %990 = vrsqrt.f32 %v446_v20  ;;  %v439_v24 = vmul.f32 0.03125, %v419_v21  ;;  %v440_v25 = vmul.f32 0.03125, %v422_v22 }
 0x136   : > { %v447_v27 = vadd.f32 1e-05, %v439_v24  ;;  %v448_v28 = vadd.f32 1e-05, %v440_v25 }
 0x137   : > { %v425_v29 = vpop.xlane.xlu1 %424  ;;  %v428_v30 = vpop.xlane.xlu0 %427 }
 0x138   : > { %992 = vrsqrt.f32 %v447_v27  ;;  %v441_v32 = vmul.f32 0.03125, %v425_v29  ;;  %v442_v34 = vmul.f32 0.03125, %v428_v30  ;;  %v985_v29 = vld [vmem:[%s1269_s6 + $0x20] sm:$0xff]   ;;  %v986_v30 = vld [vmem:[%s1269_s6 + $0x18] sm:$0xff]  }
 0x139   : > { %994 = vrsqrt.f32 %v448_v28  ;;  %v984_v28 = vld [vmem:[%s1269_s6 + $0x28] sm:$0xff]  }
 0x13a   : > { %v449_v35 = vadd.f32 1e-05, %v441_v32  ;;  %v450_v36 = vadd.f32 1e-05, %v442_v34  ;;  %v987_v32 = vld [vmem:[%s1269_s6 + $0x10] sm:$0xff]   ;;  %v988_v34 = vld [vmem:[%s1269_s6 + $0x8] sm:$0xff]  }
 0x13b   : > { %v431_v37 = vpop.xlane.xlu1 %430  ;;  %v434_v38 = vpop.xlane.xlu0 %433 }
 0x13c   : > { %996 = vrsqrt.f32 %v449_v35  ;;  %v443_v39 = vmul.f32 0.03125, %v431_v37  ;;  %v444_v42 = vmul.f32 0.03125, %v434_v38  ;;  %v989_v35 = vld [vmem:[%s1269_s6] sm:$0xff]  }
 0x13d   : > { %998 = vrsqrt.f32 %v450_v36  ;;  %v881_v36 = vld [vmem:[%s1268_s5] ss:$0 sm:$0xff] }
 0x13e   : > { %v451_v43 = vadd.f32 1e-05, %v443_v39  ;;  %v452_v44 = vadd.f32 1e-05, %v444_v42 }
 0x13f   : > { %v437_v45 = vpop.xlane.xlu1 %436 }
 0x140   : > { %1000 = vrsqrt.f32 %v451_v43  ;;  %v445_v46 = vmul.f32 0.03125, %v437_v45 }
 0x141   : > { %v991_v47 = vpop.eup %990  ;;  %1002 = vrsqrt.f32 %v452_v44 }
 0x142   : > { %v453_v49 = vadd.f32 1e-05, %v445_v46  ;;  %v462_v51 = vmul.f32 %v991_v47, %v1138_v40 }
 0x144   : > { %1004 = vrsqrt.f32 %v453_v49  ;;  %v477_v56 = vmul.f32 %v879_v52, %v462_v51 }
 0x145   : > { %v993_v53 = vpop.eup %992 }
 0x146   : > { %v995_v54 = vpop.eup %994  ;;  %v463_v55 = vmul.f32 %v993_v53, %v1148_v48  ;;  %v492_v40 = vadd.f32 %v880_v57, %v477_v56 }
 0x147   : > { %v464_v59 = vmul.f32 %v995_v54, %v1141_v41 }
 0x148   : > { %v478_v61 = vmul.f32 %v879_v52, %v463_v55 }
 0x149   : > { %v997_v62 = vpop.eup %996  ;;  %v479_v2 = vmul.f32 %v879_v52, %v464_v59 }
 0x14a   : > { %v999_v63 = vpop.eup %998  ;;  %v493_v0 = vadd.f32 %v880_v57, %v478_v61  ;;  %v465_v1 = vmul.f32 %v997_v62, %v1152_v50 }
 0x14b   : > { %v466_v3 = vmul.f32 %v999_v63, %v1160_v58  ;;  %v494_v9 = vadd.f32 %v880_v57, %v479_v2 }
 0x14c   : > { %v500_v5 = vpack.c.bf16 %v493_v0, %v492_v40  ;;  %v480_v7 = vmul.f32 %v879_v52, %v465_v1 }
 0x14d   : > { %v1001_v48 = vpop.eup %1000  ;;  %v481_v13 = vmul.f32 %v879_v52, %v466_v3 }
 0x14e   : > { %v1003_v8 = vpop.eup %1002  ;;  %940 = vmatprep.mubr.msk.bf16.mxu0 %vm364_vm0, %v500_v5  ;;  %v495_v10 = vadd.f32 %v880_v57, %v480_v7  ;;  %v467_v41 = vmul.f32 %v1001_v48, %v1164_v60 }
 0x14f   : > { %v468_v14 = vmul.f32 %v1003_v8, %v1172_v4  ;;  %v496_v50 = vadd.f32 %v880_v57, %v481_v13  ;;  %v982_v4 = vld [vmem:[%s1269_s6 + $0x38] sm:$0xff]  }
 0x150   : > { %v501_v15 = vpack.c.bf16 %v495_v10, %v494_v9  ;;  %v482_v18 = vmul.f32 %v879_v52, %v467_v41  ;;  %948 = vmatprep.subr.bf16.mxu1 %v982_v4 }
 0x151   : > { %v1005_v19 = vpop.eup %1004  ;;  %v483_v21 = vmul.f32 %v879_v52, %v468_v14  ;;  %949 = vmatpush3.bf16.msra.mxu1 %v982_v4 }
 0x152   : > { %941 = vmatmul.mubr.msk.bf16.vlgmr.msra.gmra.mxu0 %vm364_vm0, %v501_v15  ;;  %v497_v58 = vadd.f32 %v880_v57, %v482_v18  ;;  %v469_v20 = vmul.f32 %v1005_v19, %v1176_v6  ;;  %v983_v6 = vld [vmem:[%s1269_s6 + $0x30] sm:$0xff]  }
 0x153   : > { %v498_v25 = vadd.f32 %v880_v57, %v483_v21  ;;  %950 = vmatprep.subr.bf16.mxu1 %v983_v6 }
 0x154   : > { %v502_v22 = vpack.c.bf16 %v497_v58, %v496_v50  ;;  %v484_v24 = vmul.f32 %v879_v52, %v469_v20 }
 0x155   : > { %951 = vmatpush3.bf16.msra.mxu1 %v983_v6 }
 0x156   : > { %944 = vmatprep.mubr.msk.bf16.mxu0 %vm364_vm0, %v502_v22  ;;  %v499_v27 = vadd.f32 %v880_v57, %v484_v24  ;;  %952 = vmatprep.subr.bf16.mxu1 %v984_v28 }
 0x158   : > { %v503_v60 = vpack.c.bf16 %v499_v27, %v498_v25 }
 0x159   : > { %953 = vmatpush3.bf16.msra.mxu1 %v984_v28 }
 0x15a   : > { %945 = vmatmul.mubr.msk.bf16.gmra.mxu0 %vm364_vm0, %v503_v60  ;;  %954 = vmatprep.subr.bf16.mxu1 %v985_v29 }
 0x15d   : > { %955 = vmatpush3.bf16.msra.mxu1 %v985_v29 }
 0x15e   : > { %956 = vmatprep.subr.bf16.mxu1 %v986_v30 }
 0x161   : > { %957 = vmatpush3.bf16.msra.mxu1 %v986_v30 }
 0x162   : > { %958 = vmatprep.subr.bf16.mxu1 %v987_v32 }
 0x165   : > { %959 = vmatpush3.bf16.msra.mxu1 %v987_v32 }
 0x166   : > { %960 = vmatprep.subr.bf16.mxu1 %v988_v34 }
 0x169   : > { %961 = vmatpush3.bf16.msra.mxu1 %v988_v34 }
 0x16a   : > { %962 = vmatprep.subr.bf16.mxu1 %v989_v35 }
 0x16d   : > { %963 = vmatpush3.bf16.msra.mxu1 %v989_v35 }
 0x212   : > { %v942_v37 = vpop.f32.mrf.mxu0 }
 0x213   : > { %v582_v38 = vadd.f32 %v942_v37, %v881_v36 }
 0x214   : > { %v573_v39 = vpop.f32.mrf.mxu0 }
 0x215   : > { %v574_v42 = vadd.f32 %v881_v36, %v573_v39  ;;  %v614_v43 = vmul.f32 0.70710677, %v582_v38  ;;  %v606_v15 = vmul.f32 0.5, %v582_v38 }
 0x216   : > { %v943_v44 = vpop.f32.mrf.mxu0 }
 0x217   : > { %v612_v45 = vmul.f32 0.70710677, %v574_v42  ;;  %v585_v46 = vadd.f32 %v943_v44, %v881_v36  ;;  %v604_v41 = vmul.f32 0.5, %v574_v42 }
 0x218   : > { %v576_v47 = vpop.f32.mrf.mxu0 }
 0x219   : > { %1006 = verf.f32 %v612_v45  ;;  %v615_v49 = vmul.f32 0.70710677, %v585_v46  ;;  %v577_v51 = vadd.f32 %v881_v36, %v576_v47  ;;  %v607_v10 = vmul.f32 0.5, %v585_v46 }
 0x21a   : > { %1008 = verf.f32 %v614_v43  ;;  %v946_v52 = vpop.f32.mrf.mxu0  ;;  %v888_v43 = vld [vmem:[%s1270_s7] ss:$0 sm:$0xff] }
 0x21b   : > { %1010 = verf.f32 %v615_v49  ;;  %v613_v53 = vmul.f32 0.70710677, %v577_v51  ;;  %v598_v54 = vadd.f32 %v946_v52, %v881_v36  ;;  %v605_v13 = vmul.f32 0.5, %v577_v51 }
 0x21c   : > { %v589_v55 = vpop.f32.mrf.mxu0 }
 0x21d   : > { %1012 = verf.f32 %v613_v53  ;;  %v590_v56 = vadd.f32 %v881_v36, %v589_v55  ;;  %v618_v57 = vmul.f32 0.70710677, %v598_v54  ;;  %v610_v34 = vmul.f32 0.5, %v598_v54 }
 0x21e   : > { %v947_v59 = vpop.f32.mrf.mxu0 }
 0x21f   : > { %v616_v61 = vmul.f32 0.70710677, %v590_v56  ;;  %v601_v62 = vadd.f32 %v947_v59, %v881_v36  ;;  %v608_v29 = vmul.f32 0.5, %v590_v56 }
 0x220   : > { %v592_v63 = vpop.f32.mrf.mxu0 }
 0x221   : > { %1014 = verf.f32 %v616_v61  ;;  %v619_v40 = vmul.f32 0.70710677, %v601_v62  ;;  %v593_v0 = vadd.f32 %v881_v36, %v592_v63  ;;  %v611_v28 = vmul.f32 0.5, %v601_v62 }
 0x222   : > { %1016 = verf.f32 %v618_v57 }
 0x223   : > { %1018 = verf.f32 %v619_v40  ;;  %v617_v1 = vmul.f32 0.70710677, %v593_v0  ;;  %v609_v30 = vmul.f32 0.5, %v593_v0 }
 0x225   : > { %1020 = verf.f32 %v617_v1 }
 0x226   : > { %v1007_v2 = vpop.eup %1006 }
 0x227   : > { %v1009_v3 = vpop.eup %1008  ;;  %v628_v48 = vadd.f32 1.0, %v1007_v2 }
 0x228   : > { %v1011_v5 = vpop.eup %1010  ;;  %v630_v9 = vadd.f32 1.0, %v1009_v3 }
 0x229   : > { %v631_v7 = vadd.f32 1.0, %v1011_v5  ;;  %v636_v19 = vmul.f32 %v628_v48, %v604_v41 }
 0x22a   : > { %v1013_v8 = vpop.eup %1012  ;;  %v638_v20 = vmul.f32 %v630_v9, %v606_v15 }
 0x22b   : > { %v629_v14 = vadd.f32 1.0, %v1013_v8  ;;  %v639_v18 = vmul.f32 %v631_v7, %v607_v10 }
 0x22d   : > { %v637_v50 = vmul.f32 %v629_v14, %v605_v13  ;;  %v645_v25 = vpack.c.bf16 %v639_v18, %v638_v20 }
 0x22e   : > { %v1015_v58 = vpop.eup %1014 }
 0x22f   : > { %v1017_v21 = vpop.eup %1016  ;;  %v644_v22 = vpack.c.bf16 %v637_v50, %v636_v19  ;;  %v632_v27 = vadd.f32 1.0, %v1015_v58 }
 0x230   : > { %v1019_v24 = vpop.eup %1018  ;;  %v634_v6 = vadd.f32 1.0, %v1017_v21 }
 0x231   : > { %v635_v60 = vadd.f32 1.0, %v1019_v24  ;;  %964 = vmatprep.mubr.bf16.mxu1 %v644_v22  ;;  %v640_v36 = vmul.f32 %v632_v27, %v608_v29 }
 0x232   : > { %v1021_v4 = vpop.eup %1020  ;;  %965 = vmatmul.mubr.bf16.vlgmr.msra.gmra.mxu1 %v645_v25  ;;  %v642_v38 = vmul.f32 %v634_v6, %v610_v34 }
 0x233   : > { %v633_v32 = vadd.f32 1.0, %v1021_v4  ;;  %v643_v35 = vmul.f32 %v635_v60, %v611_v28 }
 0x235   : > { %v641_v37 = vmul.f32 %v633_v32, %v609_v30  ;;  %v647_v42 = vpack.c.bf16 %v643_v35, %v642_v38 }
 0x237   : > { %v646_v39 = vpack.c.bf16 %v641_v37, %v640_v36 }
 0x239   : > { %968 = vmatprep.mubr.bf16.mxu1 %v646_v39 }
 0x23a   : > { %969 = vmatmul.mubr.bf16.gmra.mxu1 %v647_v42 }
 0x2f2   : > { %v966_v44 = vpop.f32.mrf.mxu1 }
 0x2f3   : > { %v762_v45 = vadd.f32 %v966_v44, %v888_v43 }
 0x2f4   : > { %v753_v46 = vpop.f32.mrf.mxu1 }
 0x2f5   : > { %v786_v47 = vadd.f32 %v762_v45, %v1106_v16  ;;  %v754_v49 = vadd.f32 %v888_v43, %v753_v46 }
 0x2f6   : > { %v967_v51 = vpop.f32.mrf.mxu1 }
 0x2f7   : > { %794 = vst.msk [vmem:[%s329_s28 + $0x10] sm:$0xff] %vm364_vm0, %v786_v47  ;;  %v784_v52 = vadd.f32 %v754_v49, %v1101_v11  ;;  %v765_v53 = vadd.f32 %v967_v51, %v888_v43 }
 0x2f8   : > { %v756_v54 = vpop.f32.mrf.mxu1 }
 0x2f9   : > { %792 = vst.msk [vmem:[%s329_s28] sm:$0xff] %vm364_vm0, %v784_v52  ;;  %v787_v55 = vadd.f32 %v765_v53, %v1108_v17  ;;  %v757_v56 = vadd.f32 %v888_v43, %v756_v54 }
 0x2fa   : > { %v970_v57 = vpop.f32.mrf.mxu1 }
 0x2fb   : > { %795 = vst.msk [vmem:[%s329_s28 + $0x18] sm:$0xff] %vm364_vm0, %v787_v55  ;;  %v785_v59 = vadd.f32 %v757_v56, %v1103_v12  ;;  %v778_v61 = vadd.f32 %v970_v57, %v888_v43 }
 0x2fc   : > { %v769_v16 = vpop.f32.mrf.mxu1 }
 0x2fd   : > { %793 = vst.msk [vmem:[%s329_s28 + $0x8] sm:$0xff] %vm364_vm0, %v785_v59  ;;  %v790_v62 = vadd.f32 %v778_v61, %v1127_v31  ;;  %v770_v63 = vadd.f32 %v888_v43, %v769_v16 }
 0x2fe   : > { %v971_v11 = vpop.f32.mrf.mxu1 }
 0x2ff   : > { %798 = vst.msk [vmem:[%s329_s28 + $0x30] sm:$0xff] %vm364_vm0, %v790_v62  ;;  %v788_v40 = vadd.f32 %v770_v63, %v1117_v23  ;;  %v781_v0 = vadd.f32 %v971_v11, %v888_v43 }
 0x300   : > { %v772_v17 = vpop.f32.mrf.mxu1 }
 0x301   : > { %796 = vst.msk [vmem:[%s329_s28 + $0x20] sm:$0xff] %vm364_vm0, %v788_v40  ;;  %v791_v1 = vadd.f32 %v781_v0, %v1131_v33  ;;  %v773_v2 = vadd.f32 %v888_v43, %v772_v17 }
 0x303   : > { %799 = vst.msk [vmem:[%s329_s28 + $0x38] sm:$0xff] %vm364_vm0, %v791_v1  ;;  %v789_v12 = vadd.f32 %v773_v2, %v1121_v26 }
 0x305   : > { %797 = vst.msk [vmem:[%s329_s28 + $0x28] sm:$0xff] %vm364_vm0, %v789_v12 }
 0x306 PF: > { %s18_s27 = sadd.s32 1, %s1028_s27  }
 0x307   : > { %p15_p4 = scmp.ge.s32.totalorder %s18_s27, 4  }
 0x309   :  { %17 = sbr.rel (!%p15_p4) target bundleno = 1 (0x1), region = 85 }

// kernel: _basic_layer_core.4
= control target key start
LH: loop header
LB: loop body
LE: loop exit
PB: predicated region body
PF: predicated region fallthrough
CT: control target
= control target key end

     0   :  { %s1210_s30 = smov 0   ;;  %s1328_s0 = inlined_call_operand.vmem [shape: f32[8,16,32], index: 0, kind: input, shape index: {}]   ;;  %s1329_s1 = inlined_call_operand.vmem [shape: f32[1,32], index: 1, kind: input, shape index: {}]   ;;  %s1330_s2 = inlined_call_operand.vmem [shape: f32[1,32], index: 2, kind: input, shape index: {}]   ;;  %s1331_s3 = inlined_call_operand.vmem [shape: bf16[32,96], index: 3, kind: input, shape index: {}]   ;;  %s1332_s4 = inlined_call_operand.vmem [shape: f32[1,96], index: 4, kind: input, shape index: {}]   ;;  %s1333_s5 = inlined_call_operand.vmem [shape: bf16[32,32], index: 5, kind: input, shape index: {}]   ;;  %s1334_s6 = inlined_call_operand.vmem [shape: f32[1,32], index: 6, kind: input, shape index: {}]   ;;  %s1335_s7 = inlined_call_operand.vmem [shape: f32[2,16,16], index: 7, kind: input, shape index: {}]   ;;  %s1336_s8 = inlined_call_operand.vmem [shape: f32[4,16,16], index: 8, kind: input, shape index: {}]   ;;  %s1337_s9 = inlined_call_operand.vmem [shape: bf16[8,16,32], index: 9, kind: output, shape index: {}]  }
   0x1 LB: > { %s1216_s10 = sadd.s32 4294967295, %s1151_s30   ;;  %p1011_p0 = scmp.ge.s32.totalorder %s1151_s30, 1  ;;  %s1151_s30 = sphi %s1210_s30, %s19_s30  }
   0x2   : > { %p345_p1 = scmp.lt.s32.totalorder %s1151_s30, 9 }
   0x4   : > { %p346_p2 = pnand %p1011_p0, %p345_p1 }
   0x5   : > { %p398_p3 = scmp.lt.s32.totalorder (!%p346_p2), %s1216_s10, 7  ;;  %s1155_s26 = smov (!%p346_p2), 80  }
   0x6   : > { %349 = sbr.rel (%p346_p2) target bundleno = 1580 (0x62c), region = 56  ;;  %s1156_s27 = smov (!%p346_p2), 96  }
   0x7   : > { %s1157_s28 = smov (!%p346_p2), 112   ;;  %s404_s29 = ssub.s32 (!%p346_p2), 0, %s1216_s10 }
   0x8   : > { %p403_p4 = scmp.lt.s32.totalorder (!%p346_p2), %s1216_s10, 0 }
   0xb   : > { %s1222_s11 = scalar_select %p398_p3, %s1216_s10, 7  ;;  %vm440_vm0 = vcmask 261120   ;;  %v1121_v14 = vld [vmem:[%s1331_s3 + $0x8] sm:$0xff]   ;;  %v1153_v15 = vmov 0.0   ;;  %vm1154_vm1 = vmmov 0   ;;  %v1122_v16 = vld [vmem:[%s1331_s3] sm:$0xff]  }
   0xc   : > { %1062 = vmatprep.subr.bf16.mxu0 %v1153_v15  ;;  %1066 = vmatprep.mubr.msk.bf16.mxu0 %vm1154_vm1, %v1153_v15  ;;  %v1021_v25 = vld [vmem:[%s1329_s1] ss:$0 sm:$0xff]  ;;  %vm562_vm2 = vcmask 130048   ;;  %v558_v52 = vld [vmem:[%s1335_s7 + $0x8] sm:$0xff]  ;;  %v1029_v59 = vld [vmem:[%s1335_s7 + $0x10] sm:$0xff]  ;;  %vm931_vm3 = vcmask 257024  }
   0xd   : > { %s1042_s12 = sshll.u32 %s1222_s11, 4  ;;  %1063 = vmatpush3.bf16.msra.mxu0 %v1121_v14  ;;  %1070 = vmatprep.subr.bf16.mxu1 %v1153_v15  ;;  %v1022_v29 = vld [vmem:[%s1330_s2] ss:$0 sm:$0xff]  ;;  %s1044_s17 = sshll.u32 %s1222_s11, 3 }
   0xe   : > { %s402_s15 = scalar_lea.vmem %s1328_s0, %s1042_s12  ;;  %1064 = vmatprep.subr.bf16.mxu0 %v1153_v15  ;;  %1072 = vmatprep.mubr.msk.bf16.mxu1 %vm1154_vm1, %v1153_v15  ;;  %v1023_v35 = vld [vmem:[%s1332_s4] ss:$0 sm:$0xff]  ;;  %s1014_s12 = smin.u32 %s1216_s10, %s404_s29 }
   0xf   : > { %v438_v0 = vld [vmem:[%s402_s15] sm:$0xff]  ;;  %v439_v1 = vld [vmem:[%s402_s15 + $0x8] sm:$0xff]  ;;  %s406_s13 = sand.u32 3, %s1014_s12   ;;  %s436_s20 = scalar_lea.vmem %s1337_s9, %s1044_s17 }
  0x10   : > { %v441_v2 = vsel %vm440_vm0, %v438_v0, 0.0  ;;  %v444_v3 = vsel %vm440_vm0, %v439_v1, 0.0  ;;  %s407_s14 = ssub.s32 0, %s406_s13  ;;  %v557_v47 = vld [vmem:[%s1335_s7] sm:$0xff] }
  0x11   : > { %442 = vadd.xlane.f32.xlu0 %v441_v2  ;;  %1065 = vmatpush3.bf16.msra.mxu0 %v1122_v16  ;;  %s1339_s14 = smov (!%p403_p4, %s407_s14), %s406_s13 }
  0x12   : > { %1076 = vmatprep.subr.bf16.mxu0 %v1153_v15  ;;  %p1016_p5 = scmp.lt.s32.totalorder %s1339_s14, 0  ;;  %s413_s15 = sadd.s32 4, %s1339_s14 }
  0x14   : > { %s1341_s15 = smov (!%p1016_p5, %s413_s15), %s1339_s14 }
  0x15   : > { %445 = vadd.xlane.f32.xlu0 %v444_v3  ;;  %p415_p6 = scmp.lt.s32.totalorder %s1341_s15, 3 }
  0x17   : > { %s1343_s15 = smov (!%p415_p6, %s1341_s15), 3 }
  0x18   : > { %s1043_s16 = sshll.u32 %s1343_s15, 4 }
  0x19   : > { %s419_s19 = scalar_lea.vmem %s1336_s8, %s1043_s16 }
  0x1a   : > { %v555_v49 = vld [vmem:[%s419_s19] sm:$0xff]  ;;  %v556_v55 = vld [vmem:[%s419_s19 + $0x8] sm:$0xff] }
  0x9a   : > { %v443_v4 = vpop.xlane.xlu0 %442 }
  0x9b   : > { %v448_v5 = vmul.f32 0.03125, %v443_v4 }
  0x9d   : > { %v450_v6 = vsub.f32 %v438_v0, %v448_v5 }
  0x9e   : > { %v446_v7 = vpop.xlane.xlu0 %445 }
  0x9f   : > { %v449_v8 = vmul.f32 0.03125, %v446_v7  ;;  %v452_v9 = vmul.f32 %v450_v6, %v450_v6 }
  0xa1   : > { %v451_v10 = vsub.f32 %v439_v1, %v449_v8  ;;  %v454_v11 = vsel %vm440_vm0, %v452_v9, 0.0  ;;  %v1030_v1 = vld [vmem:[%s1335_s7 + $0x18] sm:$0xff] }
  0xa2   : > { %455 = vadd.xlane.f32.xlu1 %v454_v11 }
  0xa3   : > { %v453_v12 = vmul.f32 %v451_v10, %v451_v10 }
  0xa5   : > { %v457_v13 = vsel %vm440_vm0, %v453_v12, 0.0 }
  0xa6   : > { %458 = vadd.xlane.f32.xlu1 %v457_v13 }
 0x12b   : > { %v456_v17 = vpop.xlane.xlu1 %455 }
 0x12c   : > { %v460_v18 = vmul.f32 0.03125, %v456_v17 }
 0x12e   : > { %v462_v19 = vadd.f32 1e-05, %v460_v18 }
 0x12f   : > { %v459_v20 = vpop.xlane.xlu1 %458 }
 0x130   : > { %1125 = vrsqrt.f32 %v462_v19  ;;  %v461_v21 = vmul.f32 0.03125, %v459_v20 }
 0x132   : > { %v463_v22 = vadd.f32 1e-05, %v461_v21 }
 0x134   : > { %1127 = vrsqrt.f32 %v463_v22 }
 0x13d   : > { %v1126_v23 = vpop.eup %1125 }
 0x13e   : > { %v466_v24 = vmul.f32 %v1126_v23, %v450_v6 }
 0x140   : > { %v475_v28 = vmul.f32 %v1021_v25, %v466_v24 }
 0x141   : > { %v1128_v26 = vpop.eup %1127 }
 0x142   : > { %v467_v27 = vmul.f32 %v1128_v26, %v451_v10  ;;  %v484_v31 = vadd.f32 %v1022_v29, %v475_v28 }
 0x144   : > { %v476_v30 = vmul.f32 %v1021_v25, %v467_v27 }
 0x146   : > { %v485_v32 = vadd.f32 %v1022_v29, %v476_v30 }
 0x148   : > { %v486_v33 = vpack.c.bf16 %v485_v32, %v484_v31 }
 0x14a   : > { %1067 = vmatmul.mubr.msk.bf16.vlgmr.msra.gmra.mxu0 %vm440_vm0, %v486_v33 }
 0x14b   : > { %1078 = vmatprep.mubr.msk.bf16.mxu0 %vm1154_vm1, %v1153_v15 }
 0x20a   : > { %v547_v34 = vpop.f32.mrf.mxu0 }
 0x20b   : > { %v548_v38 = vadd.f32 %v1023_v35, %v547_v34 }
 0x20c   : > { %v1068_v36 = vpop.f32.mrf.mxu0 }
 0x20e   : > { %v550_v37 = vpop.f32.mrf.mxu0 }
 0x20f   : > { %v551_v39 = vadd.f32 %v1023_v35, %v550_v37 }
 0x210   : > { %v1069_v40 = vpop.f32.mrf.mxu0 }
 0x211   : > { %v1258_v41 = vpack.c.bf16 %v551_v39, %v548_v38 }
 0x213   : > { %690 = vrot.lane.b32.xlu1 %v1258_v41, %s1155_s26  ;;  %560 = vrot.lane.b32.xlu0 %v1258_v41, %s1156_s27  ;;  %s1158_s27 = smov 64  }
 0x217   : > { %688 = vrot.lane.b32.xlu1 %v1258_v41, %s1157_s28  ;;  %s1159_s28 = smov 48  }
 0x285   : > { %v561_v42 = vpop.permute.xlu0 %560  ;;  %v691_v44 = vpop.permute.xlu1 %690 }
 0x286   : > { %v567_v43 = vsel %vm562_vm2, %v561_v42, 0  ;;  %v696_v45 = vsel %vm562_vm2, %v691_v44, 0 }
 0x287   : > { %1071 = vmatpush3.bf16.xpose.msra.mxu1 %v567_v43 }
 0x288   : > { %1082 = vmatprep.subr.bf16.mxu1 %v1153_v15 }
 0x289   : > { %v689_v46 = vpop.permute.xlu1 %688 }
 0x28e   : > { %1073 = vmatmul.mubr.msk.bf16.vlgmr.msra.gmra.mxu1 %vm562_vm2, %v1258_v41 }
 0x28f   : > { %1083 = vmatpush3.bf16.xpose.msra.mxu1 %v696_v45  ;;  %1084 = vmatprep.mubr.msk.bf16.mxu1 %vm1154_vm1, %v1153_v15 }
 0x290   : > { %1094 = vmatprep.subr.bf16.mxu1 %v1153_v15 }
 0x296   : > { %1085 = vmatmul.mubr.msk.bf16.vlgmr.msra.gmra.mxu1 %vm562_vm2, %v689_v46  ;;  %v1123_v46 = vld [vmem:[%s1333_s5] sm:$0xff]  }
 0x297   : > { %1096 = vmatprep.mubr.msk.bf16.mxu1 %vm1154_vm1, %v1153_v15 }
 0x34e   : > { %v603_v48 = vpop.f32.mrf.mxu1 }
 0x34f   : > { %v604_v50 = vadd.f32 %v603_v48, %v557_v47  ;;  %v1124_v47 = vld [vmem:[%s1333_s5 + $0x8] sm:$0xff]  }
 0x350   : > { %v1074_v51 = vpop.f32.mrf.mxu1  ;;  %1095 = vmatpush3.bf16.msra.mxu1 %v1124_v47 }
 0x351   : > { %v610_v53 = vadd.f32 %v604_v50, %v555_v49 }
 0x352   : > { %v606_v54 = vpop.f32.mrf.mxu1 }
 0x353   : > { %v607_v56 = vadd.f32 %v606_v54, %v558_v52  ;;  %v612_v57 = vsel %vm562_vm2, %v610_v53, -inf }
 0x354   : > { %613 = vmax.xlane.f32.xlu1 %v612_v57  ;;  %v1075_v58 = vpop.f32.mrf.mxu1 }
 0x355   : > { %v611_v60 = vadd.f32 %v607_v56, %v556_v55 }
 0x356   : > { %v732_v61 = vpop.f32.mrf.mxu1 }
 0x357   : > { %v733_v62 = vadd.f32 %v1029_v59, %v732_v61  ;;  %v615_v63 = vsel %vm562_vm2, %v611_v60, -inf }
 0x358   : > { %616 = vmax.xlane.f32.xlu0 %v615_v63  ;;  %v1086_v0 = vpop.f32.mrf.mxu1 }
 0x359   : > { %v739_v2 = vadd.f32 %v733_v62, %v555_v49  ;;  %v1037_v62 = vld [vmem:[%s1334_s6] ss:$0 sm:$0xff] }
 0x35a   : > { %v735_v3 = vpop.f32.mrf.mxu1 }
 0x35b   : > { %v736_v4 = vadd.f32 %v1030_v1, %v735_v3  ;;  %v741_v5 = vsel %vm562_vm2, %v739_v2, -inf }
 0x35c   : > { %742 = vmax.xlane.f32.xlu0 %v741_v5  ;;  %v1087_v6 = vpop.f32.mrf.mxu1 }
 0x35d   : > { %v740_v7 = vadd.f32 %v736_v4, %v556_v55 }
 0x35f   : > { %v744_v8 = vsel %vm562_vm2, %v740_v7, -inf }
 0x360   : > { %745 = vmax.xlane.f32.xlu0 %v744_v8 }
 0x3dd   : > { %v614_v9 = vpop.xlane.xlu1 %613 }
 0x3de   : > { %v618_v10 = vsub.f32 %v610_v53, %v614_v9 }
 0x3e0   : > { %v620_v11 = vmul.f32 1.442695, %v618_v10 }
 0x3e1   : > { %v617_v12 = vpop.xlane.xlu0 %616 }
 0x3e2   : > { %1129 = vpow2.f32 %v620_v11  ;;  %v619_v13 = vsub.f32 %v611_v60, %v617_v12 }
 0x3e4   : > { %v622_v14 = vmul.f32 1.442695, %v619_v13 }
 0x3e5   : > { %v743_v16 = vpop.xlane.xlu0 %742 }
 0x3e6   : > { %1131 = vpow2.f32 %v622_v14  ;;  %v747_v17 = vsub.f32 %v739_v2, %v743_v16 }
 0x3e8   : > { %v749_v18 = vmul.f32 1.442695, %v747_v17 }
 0x3e9   : > { %v746_v19 = vpop.xlane.xlu0 %745 }
 0x3ea   : > { %1133 = vpow2.f32 %v749_v18  ;;  %v748_v20 = vsub.f32 %v740_v7, %v746_v19 }
 0x3ec   : > { %v751_v21 = vmul.f32 1.442695, %v748_v20 }
 0x3ee   : > { %1135 = vpow2.f32 %v751_v21 }
 0x3ef   : > { %v1130_v22 = vpop.eup %1129 }
 0x3f0   : > { %v624_v23 = vsel %vm562_vm2, %v1130_v22, 0.0 }
 0x3f1   : > { %625 = vadd.xlane.f32.xlu1 %v624_v23 }
 0x3f3   : > { %v1132_v24 = vpop.eup %1131 }
 0x3f4   : > { %v627_v25 = vsel %vm562_vm2, %v1132_v24, 0.0 }
 0x3f5   : > { %628 = vadd.xlane.f32.xlu0 %v627_v25 }
 0x3f7   : > { %v1134_v26 = vpop.eup %1133 }
 0x3f8   : > { %v753_v27 = vsel %vm562_vm2, %v1134_v26, 0.0 }
 0x3f9   : > { %754 = vadd.xlane.f32.xlu1 %v753_v27 }
 0x3fb   : > { %v1136_v28 = vpop.eup %1135 }
 0x3fc   : > { %v756_v29 = vsel %vm562_vm2, %v1136_v28, 0.0 }
 0x3fd   : > { %757 = vadd.xlane.f32.xlu0 %v756_v29 }
 0x40a   : > { %635 = vrot.lane.b32.xlu1 %v1258_v41, %s1158_s27 }
 0x413   : > { %764 = vrot.lane.b32.xlu0 %v1258_v41, %s1159_s28 }
 0x47a   : > { %v626_v30 = vpop.xlane.xlu1 %625 }
 0x47b   : > { %1137 = vrcp.f32 %v626_v30 }
 0x47e   : > { %v629_v31 = vpop.xlane.xlu0 %628 }
 0x47f   : > { %1139 = vrcp.f32 %v629_v31 }
 0x482   : > { %v755_v32 = vpop.xlane.xlu1 %754 }
 0x483   : > { %1141 = vrcp.f32 %v755_v32 }
 0x486   : > { %v636_v33 = vpop.permute.xlu1 %635  ;;  %v758_v34 = vpop.xlane.xlu0 %757 }
 0x487   : > { %1143 = vrcp.f32 %v758_v34  ;;  %1077 = vmatpush3.bf16.msra.mxu0 %v636_v33 }
 0x488   : > { %1088 = vmatprep.subr.bf16.mxu0 %v1153_v15  ;;  %v1138_v35 = vpop.eup %1137 }
 0x489   : > { %v632_v37 = vmul.f32 %v1138_v35, %v1130_v22 }
 0x48a   : > { %v765_v40 = vpop.permute.xlu0 %764 }
 0x48c   : > { %v1140_v36 = vpop.eup %1139 }
 0x48d   : > { %v633_v38 = vmul.f32 %v1140_v36, %v1132_v24 }
 0x48f   : > { %v634_v39 = vpack.c.bf16 %v633_v38, %v632_v37 }
 0x490   : > { %v1142_v41 = vpop.eup %1141 }
 0x491   : > { %1079 = vmatmul.mubr.msk.bf16.vlgmr.msra.gmra.mxu0 %vm562_vm2, %v634_v39  ;;  %v761_v43 = vmul.f32 %v1142_v41, %v1134_v26 }
 0x492   : > { %1089 = vmatpush3.bf16.msra.mxu0 %v765_v40  ;;  %1090 = vmatprep.mubr.msk.bf16.mxu0 %vm1154_vm1, %v1153_v15 }
 0x493   : > { %1100 = vmatprep.subr.bf16.mxu0 %v1153_v15 }
 0x494   : > { %v1144_v42 = vpop.eup %1143 }
 0x495   : > { %v762_v44 = vmul.f32 %v1144_v42, %v1136_v28 }
 0x497   : > { %v763_v45 = vpack.c.bf16 %v762_v44, %v761_v43 }
 0x499   : > { %1091 = vmatmul.mubr.msk.bf16.vlgmr.msra.gmra.mxu0 %vm562_vm2, %v763_v45 }
 0x49a   : > { %1102 = vmatprep.mubr.msk.bf16.mxu0 %vm1154_vm1, %v1153_v15  ;;  %1101 = vmatpush3.bf16.msra.mxu0 %v1123_v46 }
 0x551   : > { %v675_v48 = vpop.f32.mrf.mxu0 }
 0x553   : > { %v1080_v49 = vpop.f32.mrf.mxu0 }
 0x555   : > { %v678_v50 = vpop.f32.mrf.mxu0 }
 0x556   : > { %v682_v51 = vpack.c.bf16 %v678_v50, %v675_v48 }
 0x557   : > { %v1081_v52 = vpop.f32.mrf.mxu0 }
 0x558   : > { %1103 = vmatmul.mubr.msk.bf16.vlgmr.msra.gmra.mxu0 %vm562_vm2, %v682_v51 }
 0x559   : > { %v804_v53 = vpop.f32.mrf.mxu0 }
 0x55b   : > { %v1092_v15 = vpop.f32.mrf.mxu0 }
 0x55d   : > { %v807_v54 = vpop.f32.mrf.mxu0 }
 0x55e   : > { %v811_v55 = vpack.c.bf16 %v807_v54, %v804_v53 }
 0x55f   : > { %v1093_v56 = vpop.f32.mrf.mxu0 }
 0x560   : > { %1097 = vmatmul.mubr.msk.bf16.vlgmr.msra.gmra.mxu1 %vm562_vm2, %v811_v55 }
 0x618   : > { %v907_v57 = vpop.f32.mrf.mxu0 }
 0x61a   : > { %v1104_v58 = vpop.f32.mrf.mxu0 }
 0x61c   : > { %v910_v59 = vpop.f32.mrf.mxu0 }
 0x61e   : > { %v1105_v60 = vpop.f32.mrf.mxu0 }
 0x620   : > { %v857_v61 = vpop.f32.mrf.mxu1 }
 0x621   : > { %v908_v63 = vadd.f32 %v907_v57, %v857_v61 }
 0x622   : > { %v1098_v0 = vpop.f32.mrf.mxu1 }
 0x623   : > { %v921_v1 = vadd.f32 %v1037_v62, %v908_v63 }
 0x624   : > { %v860_v2 = vpop.f32.mrf.mxu1 }
 0x625   : > { %v1045_v3 = vpack.c.bf16 %v921_v1, %v921_v1  ;;  %v911_v4 = vadd.f32 %v910_v59, %v860_v2 }
 0x626   : > { %v1099_v5 = vpop.f32.mrf.mxu1 }
 0x627   : > { %932 = vst.msk [vmem:[%s436_s20] sm:$0xf] %vm931_vm3, %v1045_v3  ;;  %v922_v6 = vadd.f32 %v1037_v62, %v911_v4 }
 0x629   : > { %v1046_v7 = vpack.c.bf16 %v922_v6, %v922_v6 }
 0x62b   : > { %933 = vst.msk [vmem:[%s436_s20 + $0x4] sm:$0xf] %vm931_vm3, %v1046_v7 }
 0x62c PF: > { %s19_s30 = sadd.s32 1, %s1151_s30  }
 0x62d   : > { %p16_p7 = scmp.ge.s32.totalorder %s19_s30, 10  }
 0x62f   :  { %18 = sbr.rel (!%p16_p7) target bundleno = 1 (0x1), region = 90 }

</bundles_post_ra>
